<compile_context>
chip_gen: v7x
topology: tpu7x:2x2x1
jax: 0.10.0
libtpu: 0.0.40
codegen_flags: <defaults>
</compile_context>

<pallas_src>
import math
from functools import partial

import jax
import jax.numpy as jnp
from jax.experimental import pallas as pl
from jax.experimental.pallas import tpu as pltpu


def mha_rope_kernel(x_ref, mask_ref, cos_ref, sin_ref,
                    wq_ref, bq_ref, wk_ref, bk_ref, wv_ref, bv_ref,
                    wd_ref, bd_ref, gamma_ref, beta_ref, o_ref,
                    *, n_heads, head_dim, block_b, seq_len, eps, mxu_dtype):
    Bt, S, d = block_b, seq_len, head_dim
    H = n_heads * d
    N = Bt * S
    d2 = d // 2
    f32 = jnp.float32

    # ---- hoisted full-width loads (outside the head loop) --------------------
    x2 = x_ref[...].reshape(N, H).astype(f32)            # (Bt*S, H), f32 residual path
    mask = mask_ref[...].astype(f32)                      # (1|Bt, S, S) additive
    cos2 = cos_ref[...].astype(f32)                       # (S, d) = [cos | cos]
    sin2 = sin_ref[...].astype(f32)                       # (S, d) = [-sin | sin]
    # Bt-broadcast hoisted once (JAX does not CSE broadcast_in_dim in the loop).
    cos_b = jnp.broadcast_to(cos2[None], (Bt, S, d))
    sin_b = jnp.broadcast_to(sin2[None], (Bt, S, d))

    # Single activation cast for the MXU (no-op when mxu_dtype == float32).
    x2_mxu = x2.astype(mxu_dtype)

    # ---- QKV projections at M = Bt*S rows to fill the MXU --------------------
    # Wq/bq: column-permuted (real|imag per head) AND pre-scaled by 1/sqrt(d);
    # Wk/bk: column-permuted.  Scores therefore come out already scaled.
    # Weights arrive already in mxu_dtype from the wrapper; accumulate in f32.
    q = jnp.dot(x2_mxu, wq_ref[...], preferred_element_type=f32) + bq_ref[...]
    k = jnp.dot(x2_mxu, wk_ref[...], preferred_element_type=f32) + bk_ref[...]
    v = jnp.dot(x2_mxu, wv_ref[...], preferred_element_type=f32) + bv_ref[...]
    v_mxu = v.astype(mxu_dtype)                           # cast once for p @ v

    ctx_heads = []
    # Static Python loop: n_heads is small for SASRec.  For many heads switch
    # to lax.fori_loop(..., unroll=True) / batched-head einsums to bound vregs.
    for h in range(n_heads):
        lo = h * d
        q_h = q[:, lo:lo + d]                             # (N, d) lane-aligned slice
        k_h = k[:, lo:lo + d]

        # RoPE as rotate-half: XLU roll + VPU multiplies, all in f32.
        q_hr = pltpu.roll(q_h, d2, 1)
        k_hr = pltpu.roll(k_h, d2, 1)
        q_rot = q_h.reshape(Bt, S, d) * cos_b + q_hr.reshape(Bt, S, d) * sin_b
        k_rot = k_h.reshape(Bt, S, d) * cos_b + k_hr.reshape(Bt, S, d) * sin_b

        # scores: single K=d contraction per (batch, head); mask broadcasts.
        s = jnp.einsum('bqd,bkd->bqk',
                       q_rot.astype(mxu_dtype), k_rot.astype(mxu_dtype),
                       preferred_element_type=f32)
        s = s + mask

        # numerically-stable softmax; exact divide for parity with reference.
        s = s - jnp.max(s, axis=-1, keepdims=True)
        p = jnp.exp(s)
        p = p / jnp.sum(p, axis=-1, keepdims=True)
        # TODO(synk): attn_dropout omitted (identity in eval mode).

        ctx = jnp.einsum('bqk,bkd->bqd',
                         p.astype(mxu_dtype),
                         v_mxu[:, lo:lo + d].reshape(Bt, S, d),
                         preferred_element_type=f32)
        ctx_heads.append(ctx.reshape(N, d))

    # Lane-aligned (N, H) context slab -> ONE K=H output projection.
    ctx_all = ctx_heads[0] if n_heads == 1 else jnp.concatenate(ctx_heads, axis=-1)
    out = jnp.dot(ctx_all.astype(mxu_dtype), wd_ref[...],
                  preferred_element_type=f32) + bd_ref[...]
    # TODO(synk): out_dropout omitted (identity in eval mode).

    # residual + LayerNorm
    resid = out + x2
    mu = jnp.mean(resid, axis=-1, keepdims=True)
    var = jnp.mean(jnp.square(resid - mu), axis=-1, keepdims=True)
    y = (resid - mu) * jax.lax.rsqrt(var + eps) * gamma_ref[...] + beta_ref[...]
    o_ref[...] = y.reshape(Bt, S, H).astype(o_ref.dtype)


def multi_head_attention(x, mask, cos, sin, params, *, n_heads, eps=1e-12,
                         block_b=None, mxu_dtype=jnp.bfloat16):
    B, S, H = x.shape
    assert H % n_heads == 0
    d = H // n_heads
    assert d % 2 == 0

    # batch-block size: target ~512 projection rows per step, keep >= 2 grid
    # steps when possible (v7x has two TensorCores), and divide B evenly.
    if block_b is None:
        block_b = max(1, 512 // max(S, 1))
    block_b = int(min(max(block_b, 1), B))
    if B >= 2:
        block_b = max(1, min(block_b, B // 2))
    while B % block_b:
        block_b -= 1
    Bt = block_b

    w_dtype = jnp.dtype(mxu_dtype)

    # De-interleave permutation (evens then odds per head) applied to the OUTPUT
    # columns of Wq/Wk so RoPE becomes rotate-half; 1/sqrt(d) folded into Wq/bq.
    # In a real model this parameter prep happens once at load time.
    perm = jnp.concatenate(
        [jnp.concatenate([jnp.arange(0, d, 2), jnp.arange(1, d, 2)]) + h * d
         for h in range(n_heads)])
    inv_sqrt_d = 1.0 / math.sqrt(d)
    wq_p = (params["wq"][:, perm] * inv_sqrt_d).astype(w_dtype)
    bq_p = (params["bq"][:, perm] * inv_sqrt_d).astype(jnp.float32)
    wk_p = params["wk"][:, perm].astype(w_dtype)
    bk_p = params["bk"][:, perm].astype(jnp.float32)
    wv_p = params["wv"].astype(w_dtype)
    wd_p = params["wd"].astype(w_dtype)

    # Rotate-half rotary tables as (S, d) constants (broadcast over Bt in-kernel).
    cos_full = jnp.concatenate([cos, cos], axis=-1).astype(jnp.float32)    # (S, d)
    sin_full = jnp.concatenate([-sin, sin], axis=-1).astype(jnp.float32)   # (S, d)

    # Additive attention mask: accept (S,S), (1,1,S,S) or (B,1,S,S).
    mask3 = jnp.asarray(mask).reshape(-1, S, S)
    if mask3.shape[0] == 1:
        # Shared mask: constant block index -> DMA'd once, never re-fetched.
        mask_spec = pl.BlockSpec((1, S, S), lambda i: (0, 0, 0))
        mask_rows = 1
    elif mask3.shape[0] == B:
        mask_spec = pl.BlockSpec((Bt, S, S), lambda i: (i, 0, 0))
        mask_rows = Bt
    else:
        raise ValueError("attention mask must broadcast over the batch")

    def const(shape):
        # Full-array block with a constant index: fetched once, reused for all
        # grid steps (weights / biases / rotary tables).
        return pl.BlockSpec(shape, lambda i: (0,) * len(shape))

    kernel = partial(mha_rope_kernel, n_heads=n_heads, head_dim=d,
                     block_b=Bt, seq_len=S, eps=eps, mxu_dtype=w_dtype)

    grid_spec = pltpu.PrefetchScalarGridSpec(
        num_scalar_prefetch=0,
        grid=(B // Bt,),
        in_specs=[
            pl.BlockSpec((Bt, S, H), lambda i: (i, 0, 0)),   # x
            mask_spec,                                       # mask
            const((S, d)), const((S, d)),                    # cos, sin
            const((H, H)), const((1, H)),                    # Wq, bq (perm+scaled)
            const((H, H)), const((1, H)),                    # Wk, bk (permuted)
            const((H, H)), const((1, H)),                    # Wv, bv
            const((H, H)), const((1, H)),                    # Wd, bd
            const((1, H)), const((1, H)),                    # gamma, beta
        ],
        out_specs=pl.BlockSpec((Bt, S, H), lambda i: (i, 0, 0)),
    )

    # VMEM budget: double-buffered x/out tiles + (double-buffered) constant
    # blocks + rough f32 working set; clamp to 56 MiB (v7x headroom).
    tile_bytes = Bt * S * H * 4
    const_bytes = (4 * H * H * w_dtype.itemsize      # Wq/Wk/Wv/Wd
                   + 6 * H * 4                       # bq/bk/bv/bd/gamma/beta
                   + 2 * S * d * 4                   # cos/sin
                   + mask_rows * S * S * 4)          # mask
    work_bytes = 10 * Bt * S * H * 4 + 4 * Bt * S * S * 4
    est = 2 * 2 * tile_bytes + 2 * const_bytes + work_bytes
    vmem_limit = int(min(56 * 2 ** 20, max(32 * 2 ** 20, 2 * est)))

    return pl.pallas_call(
        kernel,
        out_shape=jax.ShapeDtypeStruct((B, S, H), x.dtype),
        grid_spec=grid_spec,
        compiler_params=pltpu.CompilerParams(
            dimension_semantics=("parallel",),
            vmem_limit_bytes=vmem_limit),
    )(x, mask3, cos_full, sin_full, wq_p, bq_p, wk_p, bk_p,
      wv_p, params["bv"].astype(jnp.float32), wd_p,
      params["bd"].astype(jnp.float32),
      params["gamma"].astype(jnp.float32), params["beta"].astype(jnp.float32))


def reference(x, mask, cos, sin, params, n_heads, eps=1e-12):
    """Pure-JAX mirror of the PyTorch forward (interleaved complex RoPE)."""
    B, S, H = x.shape
    d = H // n_heads
    q = x @ params["wq"] + params["bq"]
    k = x @ params["wk"] + params["bk"]
    v = x @ params["wv"] + params["bv"]
    q = q.reshape(B, S, n_heads, d)
    k = k.reshape(B, S, n_heads, d)
    v = v.reshape(B, S, n_heads, d).transpose(0, 2, 1, 3)

    def rope(t):
        tr, ti = t[..., 0::2], t[..., 1::2]
        c = cos[None, :, None, :]
        s = sin[None, :, None, :]
        orr = tr * c - ti * s
        oii = tr * s + ti * c
        return jnp.stack([orr, oii], axis=-1).reshape(B, S, n_heads, d)

    q = rope(q).transpose(0, 2, 1, 3)                 # (B, nh, S, d)
    k = rope(k).transpose(0, 2, 3, 1)                 # (B, nh, d, S)
    scores = q @ k / math.sqrt(d) + mask              # (B, nh, S, S)
    probs = jax.nn.softmax(scores, axis=-1)
    ctx = (probs @ v).transpose(0, 2, 1, 3).reshape(B, S, H)
    out = ctx @ params["wd"] + params["bd"]
    resid = out + x
    mu = resid.mean(-1, keepdims=True)
    var = ((resid - mu) ** 2).mean(-1, keepdims=True)
    return (resid - mu) / jnp.sqrt(var + eps) * params["gamma"] + params["beta"]


if __name__ == "__main__":
    # head_dim = 128 so per-head slices and the rotate-half roll are lane-aligned.
    B, S, H, n_heads = 4, 16, 256, 2
    d = H // n_heads
    eps = 1e-12

    key = jax.random.PRNGKey(0)
    ks = jax.random.split(key, 12)

    params = {
        "wq": 0.05 * jax.random.normal(ks[0], (H, H), jnp.float32),
        "bq": 0.01 * jax.random.normal(ks[1], (1, H), jnp.float32),
        "wk": 0.05 * jax.random.normal(ks[2], (H, H), jnp.float32),
        "bk": 0.01 * jax.random.normal(ks[3], (1, H), jnp.float32),
        "wv": 0.05 * jax.random.normal(ks[4], (H, H), jnp.float32),
        "bv": 0.01 * jax.random.normal(ks[5], (1, H), jnp.float32),
        "wd": 0.05 * jax.random.normal(ks[6], (H, H), jnp.float32),
        "bd": 0.01 * jax.random.normal(ks[7], (1, H), jnp.float32),
        "gamma": jnp.ones((1, H), jnp.float32),
        "beta": jnp.zeros((1, H), jnp.float32),
    }

    x = jax.random.normal(ks[8], (B, S, H), jnp.float32)

    # shared causal additive attention mask, shape (1, 1, S, S)
    causal = jnp.tril(jnp.ones((S, S), jnp.float32))
    mask = jnp.where(causal > 0, 0.0, -1e9)[None, None]

    # RoPE frequencies (freqs_cis = exp(i * t * theta^{-2k/d}))
    inv_freq = 1.0 / (10000.0 ** (jnp.arange(0, d, 2, dtype=jnp.float32) / d))
    angles = jnp.arange(S, dtype=jnp.float32)[:, None] * inv_freq[None, :]
    cos, sin = jnp.cos(angles), jnp.sin(angles)       # (S, d/2) each

    # Ground-truth reference in full f32 matmul precision.
    with jax.default_matmul_precision("float32"):
        ref = reference(x, mask, cos, sin, params, n_heads, eps=eps)

    # 1) f32 MXU path: tight tolerance (exact softmax divide, f32 matmuls).
    out_f32 = multi_head_attention(x, mask, cos, sin, params, n_heads=n_heads,
                                   eps=eps, mxu_dtype=jnp.float32)
    out_f32 = jax.block_until_ready(out_f32)
    assert out_f32.shape == (B, S, H)
    err32 = float(jnp.abs(out_f32 - ref).max())
    assert jnp.allclose(out_f32, ref, atol=2e-3, rtol=2e-3), err32

    # 2) default bf16-MXU path (perf config): looser tolerance vs f32 reference.
    out_bf16 = multi_head_attention(x, mask, cos, sin, params, n_heads=n_heads,
                                    eps=eps)
    out_bf16 = jax.block_until_ready(out_bf16)
    err16 = float(jnp.abs(out_bf16 - ref).max())
    assert jnp.allclose(out_bf16, ref, atol=5e-2, rtol=5e-2), err16

    print("KERNEL_OK")
</pallas_src>

<mosaic_0001>
module attributes {stable_mosaic.version = 11 : i64} {
  func.func @mha_rope_kernel(%arg0: i32, %arg1: memref<2x16x256xf32, #tpu.memory_space<vmem>>, %arg2: memref<1x16x16xf32, #tpu.memory_space<vmem>>, %arg3: memref<16x128xf32, #tpu.memory_space<vmem>>, %arg4: memref<16x128xf32, #tpu.memory_space<vmem>>, %arg5: memref<256x256xf32, #tpu.memory_space<vmem>>, %arg6: memref<1x256xf32, #tpu.memory_space<vmem>>, %arg7: memref<256x256xf32, #tpu.memory_space<vmem>>, %arg8: memref<1x256xf32, #tpu.memory_space<vmem>>, %arg9: memref<256x256xf32, #tpu.memory_space<vmem>>, %arg10: memref<1x256xf32, #tpu.memory_space<vmem>>, %arg11: memref<256x256xf32, #tpu.memory_space<vmem>>, %arg12: memref<1x256xf32, #tpu.memory_space<vmem>>, %arg13: memref<1x256xf32, #tpu.memory_space<vmem>>, %arg14: memref<1x256xf32, #tpu.memory_space<vmem>>, %arg15: memref<2x16x256xf32, #tpu.memory_space<vmem>>) attributes {dimension_semantics = [#tpu.dimension_semantics<parallel>], iteration_bounds = array<i64: 2>, scalar_prefetch = 0 : i64, scratch_operands = 0 : i64, tpu.core_type = #tpu.core_type<tc>, window_params = [{transform_indices = @transform_0, window_bounds = array<i64: 2, 16, 256>}, {pipeline_mode = #tpu.pipeline_mode<synchronous>, transform_indices = @transform_1, window_bounds = array<i64: 1, 16, 16>}, {pipeline_mode = #tpu.pipeline_mode<synchronous>, transform_indices = @transform_2, window_bounds = array<i64: 16, 128>}, {pipeline_mode = #tpu.pipeline_mode<synchronous>, transform_indices = @transform_3, window_bounds = array<i64: 16, 128>}, {pipeline_mode = #tpu.pipeline_mode<synchronous>, transform_indices = @transform_4, window_bounds = array<i64: 256, 256>}, {pipeline_mode = #tpu.pipeline_mode<synchronous>, transform_indices = @transform_5, window_bounds = array<i64: 1, 256>}, {pipeline_mode = #tpu.pipeline_mode<synchronous>, transform_indices = @transform_6, window_bounds = array<i64: 256, 256>}, {pipeline_mode = #tpu.pipeline_mode<synchronous>, transform_indices = @transform_7, window_bounds = array<i64: 1, 256>}, {pipeline_mode = #tpu.pipeline_mode<synchronous>, transform_indices = @transform_8, window_bounds = array<i64: 256, 256>}, {pipeline_mode = #tpu.pipeline_mode<synchronous>, transform_indices = @transform_9, window_bounds = array<i64: 1, 256>}, {pipeline_mode = #tpu.pipeline_mode<synchronous>, transform_indices = @transform_10, window_bounds = array<i64: 256, 256>}, {pipeline_mode = #tpu.pipeline_mode<synchronous>, transform_indices = @transform_11, window_bounds = array<i64: 1, 256>}, {pipeline_mode = #tpu.pipeline_mode<synchronous>, transform_indices = @transform_12, window_bounds = array<i64: 1, 256>}, {pipeline_mode = #tpu.pipeline_mode<synchronous>, transform_indices = @transform_13, window_bounds = array<i64: 1, 256>}, {transform_indices = @transform_14, window_bounds = array<i64: 2, 16, 256>}]} {
    %c0 = arith.constant 0 : index
    %c0_0 = arith.constant 0 : index
    %c0_1 = arith.constant 0 : index
    %0 = vector.load %arg1[%c0, %c0_0, %c0_1] : memref<2x16x256xf32, #tpu.memory_space<vmem>>, vector<2x16x256xf32>
    %1 = vector.shape_cast %0 : vector<2x16x256xf32> to vector<32x256xf32>
    %c0_2 = arith.constant 0 : index
    %c0_3 = arith.constant 0 : index
    %c0_4 = arith.constant 0 : index
    %2 = vector.load %arg2[%c0_2, %c0_3, %c0_4] : memref<1x16x16xf32, #tpu.memory_space<vmem>>, vector<1x16x16xf32>
    %c0_5 = arith.constant 0 : index
    %c0_6 = arith.constant 0 : index
    %3 = vector.load %arg3[%c0_5, %c0_6] : memref<16x128xf32, #tpu.memory_space<vmem>>, vector<16x128xf32>
    %c0_7 = arith.constant 0 : index
    %c0_8 = arith.constant 0 : index
    %4 = vector.load %arg4[%c0_7, %c0_8] : memref<16x128xf32, #tpu.memory_space<vmem>>, vector<16x128xf32>
    %5 = vector.shape_cast %3 : vector<16x128xf32> to vector<1x16x128xf32>
    %6 = vector.shape_cast %5 : vector<1x16x128xf32> to vector<1x16x128xf32>
    %7 = vector.broadcast %6 : vector<1x16x128xf32> to vector<2x16x128xf32>
    %8 = vector.shape_cast %4 : vector<16x128xf32> to vector<1x16x128xf32>
    %9 = vector.shape_cast %8 : vector<1x16x128xf32> to vector<1x16x128xf32>
    %10 = vector.broadcast %9 : vector<1x16x128xf32> to vector<2x16x128xf32>
    %c0_9 = arith.constant 0 : index
    %c0_10 = arith.constant 0 : index
    %11 = vector.load %arg5[%c0_9, %c0_10] : memref<256x256xf32, #tpu.memory_space<vmem>>, vector<256x256xf32>
    %cst = arith.constant dense<0.000000e+00> : vector<32x256xf32>
    %12 = tpu.matmul %1, %11, %cst {dimension_numbers = #tpu.dot_dimension_numbers<[1], [0], [0], [1], [0, 0, 1, 1], [], []>} : vector<32x256xf32>, vector<256x256xf32>, vector<32x256xf32> -> vector<32x256xf32>
    %c0_11 = arith.constant 0 : index
    %c0_12 = arith.constant 0 : index
    %13 = vector.load %arg6[%c0_11, %c0_12] : memref<1x256xf32, #tpu.memory_space<vmem>>, vector<1x256xf32>
    %14 = vector.broadcast %13 : vector<1x256xf32> to vector<32x256xf32>
    %15 = arith.addf %12, %14 : vector<32x256xf32>
    %c0_13 = arith.constant 0 : index
    %c0_14 = arith.constant 0 : index
    %16 = vector.load %arg7[%c0_13, %c0_14] : memref<256x256xf32, #tpu.memory_space<vmem>>, vector<256x256xf32>
    %cst_15 = arith.constant dense<0.000000e+00> : vector<32x256xf32>
    %17 = tpu.matmul %1, %16, %cst_15 {dimension_numbers = #tpu.dot_dimension_numbers<[1], [0], [0], [1], [0, 0, 1, 1], [], []>} : vector<32x256xf32>, vector<256x256xf32>, vector<32x256xf32> -> vector<32x256xf32>
    %c0_16 = arith.constant 0 : index
    %c0_17 = arith.constant 0 : index
    %18 = vector.load %arg8[%c0_16, %c0_17] : memref<1x256xf32, #tpu.memory_space<vmem>>, vector<1x256xf32>
    %19 = vector.broadcast %18 : vector<1x256xf32> to vector<32x256xf32>
    %20 = arith.addf %17, %19 : vector<32x256xf32>
    %c0_18 = arith.constant 0 : index
    %c0_19 = arith.constant 0 : index
    %21 = vector.load %arg9[%c0_18, %c0_19] : memref<256x256xf32, #tpu.memory_space<vmem>>, vector<256x256xf32>
    %cst_20 = arith.constant dense<0.000000e+00> : vector<32x256xf32>
    %22 = tpu.matmul %1, %21, %cst_20 {dimension_numbers = #tpu.dot_dimension_numbers<[1], [0], [0], [1], [0, 0, 1, 1], [], []>} : vector<32x256xf32>, vector<256x256xf32>, vector<32x256xf32> -> vector<32x256xf32>
    %c0_21 = arith.constant 0 : index
    %c0_22 = arith.constant 0 : index
    %23 = vector.load %arg10[%c0_21, %c0_22] : memref<1x256xf32, #tpu.memory_space<vmem>>, vector<1x256xf32>
    %24 = vector.broadcast %23 : vector<1x256xf32> to vector<32x256xf32>
    %25 = arith.addf %22, %24 : vector<32x256xf32>
    %26 = vector.extract_strided_slice %15 {offsets = [0, 0], sizes = [32, 128], strides = [1, 1]} : vector<32x256xf32> to vector<32x128xf32>
    %27 = vector.extract_strided_slice %20 {offsets = [0, 0], sizes = [32, 128], strides = [1, 1]} : vector<32x256xf32> to vector<32x128xf32>
    %c64_i32 = arith.constant 64 : i32
    %28 = tpu.dynamic_rotate %26 by %c64_i32 dim 1 : vector<32x128xf32>, i32 -> vector<32x128xf32>
    %c64_i32_23 = arith.constant 64 : i32
    %29 = tpu.dynamic_rotate %27 by %c64_i32_23 dim 1 : vector<32x128xf32>, i32 -> vector<32x128xf32>
    %30 = vector.shape_cast %26 : vector<32x128xf32> to vector<2x16x128xf32>
    %31 = arith.mulf %30, %7 : vector<2x16x128xf32>
    %32 = vector.shape_cast %28 : vector<32x128xf32> to vector<2x16x128xf32>
    %33 = arith.mulf %32, %10 : vector<2x16x128xf32>
    %34 = arith.addf %31, %33 : vector<2x16x128xf32>
    %35 = vector.shape_cast %27 : vector<32x128xf32> to vector<2x16x128xf32>
    %36 = arith.mulf %35, %7 : vector<2x16x128xf32>
    %37 = vector.shape_cast %29 : vector<32x128xf32> to vector<2x16x128xf32>
    %38 = arith.mulf %37, %10 : vector<2x16x128xf32>
    %39 = arith.addf %36, %38 : vector<2x16x128xf32>
    "tpu.trace_start"() <{level = 10 : i32, message = "bqd,bkd->bqk"}> : () -> ()
    %cst_24 = arith.constant dense<0.000000e+00> : vector<2x16x16xf32>
    %40 = tpu.matmul %34, %39, %cst_24 {dimension_numbers = #tpu.dot_dimension_numbers<[2], [2], [1], [1], [0, 0, 0, 1, 1, 1], [0], [0]>} : vector<2x16x128xf32>, vector<2x16x128xf32>, vector<2x16x16xf32> -> vector<2x16x16xf32>
    "tpu.trace_stop"() : () -> ()
    %41 = vector.broadcast %2 : vector<1x16x16xf32> to vector<2x16x16xf32>
    %42 = arith.addf %40, %41 : vector<2x16x16xf32>
    %cst_25 = arith.constant dense<0xFF800000> : vector<2x16xf32>
    %43 = vector.multi_reduction <maximumf>, %42, %cst_25 [2] : vector<2x16x16xf32> to vector<2x16xf32>
    %44 = vector.shape_cast %43 : vector<2x16xf32> to vector<2x16x1xf32>
    %45 = vector.broadcast %44 : vector<2x16x1xf32> to vector<2x16x16xf32>
    %46 = arith.subf %42, %45 : vector<2x16x16xf32>
    %47 = math.exp %46 : vector<2x16x16xf32>
    %cst_26 = arith.constant dense<0.000000e+00> : vector<2x16xf32>
    %48 = vector.multi_reduction <add>, %47, %cst_26 [2] : vector<2x16x16xf32> to vector<2x16xf32>
    %49 = vector.shape_cast %48 : vector<2x16xf32> to vector<2x16x1xf32>
    %50 = vector.broadcast %49 : vector<2x16x1xf32> to vector<2x16x16xf32>
    %51 = arith.divf %47, %50 : vector<2x16x16xf32>
    %52 = vector.extract_strided_slice %25 {offsets = [0, 0], sizes = [32, 128], strides = [1, 1]} : vector<32x256xf32> to vector<32x128xf32>
    %53 = vector.shape_cast %52 : vector<32x128xf32> to vector<2x16x128xf32>
    "tpu.trace_start"() <{level = 10 : i32, message = "bqk,bkd->bqd"}> : () -> ()
    %cst_27 = arith.constant dense<0.000000e+00> : vector<2x16x128xf32>
    %54 = tpu.matmul %51, %53, %cst_27 {dimension_numbers = #tpu.dot_dimension_numbers<[2], [1], [1], [2], [0, 0, 0, 1, 1, 2], [0], [0]>} : vector<2x16x16xf32>, vector<2x16x128xf32>, vector<2x16x128xf32> -> vector<2x16x128xf32>
    "tpu.trace_stop"() : () -> ()
    %55 = vector.shape_cast %54 : vector<2x16x128xf32> to vector<32x128xf32>
    %56 = vector.extract_strided_slice %15 {offsets = [0, 128], sizes = [32, 128], strides = [1, 1]} : vector<32x256xf32> to vector<32x128xf32>
    %57 = vector.extract_strided_slice %20 {offsets = [0, 128], sizes = [32, 128], strides = [1, 1]} : vector<32x256xf32> to vector<32x128xf32>
    %c64_i32_28 = arith.constant 64 : i32
    %58 = tpu.dynamic_rotate %56 by %c64_i32_28 dim 1 : vector<32x128xf32>, i32 -> vector<32x128xf32>
    %c64_i32_29 = arith.constant 64 : i32
    %59 = tpu.dynamic_rotate %57 by %c64_i32_29 dim 1 : vector<32x128xf32>, i32 -> vector<32x128xf32>
    %60 = vector.shape_cast %56 : vector<32x128xf32> to vector<2x16x128xf32>
    %61 = arith.mulf %60, %7 : vector<2x16x128xf32>
    %62 = vector.shape_cast %58 : vector<32x128xf32> to vector<2x16x128xf32>
    %63 = arith.mulf %62, %10 : vector<2x16x128xf32>
    %64 = arith.addf %61, %63 : vector<2x16x128xf32>
    %65 = vector.shape_cast %57 : vector<32x128xf32> to vector<2x16x128xf32>
    %66 = arith.mulf %65, %7 : vector<2x16x128xf32>
    %67 = vector.shape_cast %59 : vector<32x128xf32> to vector<2x16x128xf32>
    %68 = arith.mulf %67, %10 : vector<2x16x128xf32>
    %69 = arith.addf %66, %68 : vector<2x16x128xf32>
    "tpu.trace_start"() <{level = 10 : i32, message = "bqd,bkd->bqk"}> : () -> ()
    %cst_30 = arith.constant dense<0.000000e+00> : vector<2x16x16xf32>
    %70 = tpu.matmul %64, %69, %cst_30 {dimension_numbers = #tpu.dot_dimension_numbers<[2], [2], [1], [1], [0, 0, 0, 1, 1, 1], [0], [0]>} : vector<2x16x128xf32>, vector<2x16x128xf32>, vector<2x16x16xf32> -> vector<2x16x16xf32>
    "tpu.trace_stop"() : () -> ()
    %71 = vector.broadcast %2 : vector<1x16x16xf32> to vector<2x16x16xf32>
    %72 = arith.addf %70, %71 : vector<2x16x16xf32>
    %cst_31 = arith.constant dense<0xFF800000> : vector<2x16xf32>
    %73 = vector.multi_reduction <maximumf>, %72, %cst_31 [2] : vector<2x16x16xf32> to vector<2x16xf32>
    %74 = vector.shape_cast %73 : vector<2x16xf32> to vector<2x16x1xf32>
    %75 = vector.broadcast %74 : vector<2x16x1xf32> to vector<2x16x16xf32>
    %76 = arith.subf %72, %75 : vector<2x16x16xf32>
    %77 = math.exp %76 : vector<2x16x16xf32>
    %cst_32 = arith.constant dense<0.000000e+00> : vector<2x16xf32>
    %78 = vector.multi_reduction <add>, %77, %cst_32 [2] : vector<2x16x16xf32> to vector<2x16xf32>
    %79 = vector.shape_cast %78 : vector<2x16xf32> to vector<2x16x1xf32>
    %80 = vector.broadcast %79 : vector<2x16x1xf32> to vector<2x16x16xf32>
    %81 = arith.divf %77, %80 : vector<2x16x16xf32>
    %82 = vector.extract_strided_slice %25 {offsets = [0, 128], sizes = [32, 128], strides = [1, 1]} : vector<32x256xf32> to vector<32x128xf32>
    %83 = vector.shape_cast %82 : vector<32x128xf32> to vector<2x16x128xf32>
    "tpu.trace_start"() <{level = 10 : i32, message = "bqk,bkd->bqd"}> : () -> ()
    %cst_33 = arith.constant dense<0.000000e+00> : vector<2x16x128xf32>
    %84 = tpu.matmul %81, %83, %cst_33 {dimension_numbers = #tpu.dot_dimension_numbers<[2], [1], [1], [2], [0, 0, 0, 1, 1, 2], [0], [0]>} : vector<2x16x16xf32>, vector<2x16x128xf32>, vector<2x16x128xf32> -> vector<2x16x128xf32>
    "tpu.trace_stop"() : () -> ()
    %85 = vector.shape_cast %84 : vector<2x16x128xf32> to vector<32x128xf32>
    %86 = tpu.concatenate %55, %85 in 1 : vector<32x128xf32>, vector<32x128xf32> -> vector<32x256xf32>
    %c0_34 = arith.constant 0 : index
    %c0_35 = arith.constant 0 : index
    %87 = vector.load %arg11[%c0_34, %c0_35] : memref<256x256xf32, #tpu.memory_space<vmem>>, vector<256x256xf32>
    %cst_36 = arith.constant dense<0.000000e+00> : vector<32x256xf32>
    %88 = tpu.matmul %86, %87, %cst_36 {dimension_numbers = #tpu.dot_dimension_numbers<[1], [0], [0], [1], [0, 0, 1, 1], [], []>} : vector<32x256xf32>, vector<256x256xf32>, vector<32x256xf32> -> vector<32x256xf32>
    %c0_37 = arith.constant 0 : index
    %c0_38 = arith.constant 0 : index
    %89 = vector.load %arg12[%c0_37, %c0_38] : memref<1x256xf32, #tpu.memory_space<vmem>>, vector<1x256xf32>
    %90 = vector.broadcast %89 : vector<1x256xf32> to vector<32x256xf32>
    %91 = arith.addf %88, %90 : vector<32x256xf32>
    %92 = arith.addf %91, %1 : vector<32x256xf32>
    %cst_39 = arith.constant dense<0.000000e+00> : vector<32xf32>
    %93 = vector.multi_reduction <add>, %92, %cst_39 [1] : vector<32x256xf32> to vector<32xf32>
    %94 = vector.shape_cast %93 : vector<32xf32> to vector<32x1xf32>
    %cst_40 = arith.constant 2.560000e+02 : f32
    %95 = vector.broadcast %cst_40 : f32 to vector<32x1xf32>
    %96 = arith.divf %94, %95 : vector<32x1xf32>
    %97 = vector.broadcast %96 : vector<32x1xf32> to vector<32x256xf32>
    %98 = arith.subf %92, %97 : vector<32x256xf32>
    %99 = arith.mulf %98, %98 : vector<32x256xf32>
    %cst_41 = arith.constant dense<0.000000e+00> : vector<32xf32>
    %100 = vector.multi_reduction <add>, %99, %cst_41 [1] : vector<32x256xf32> to vector<32xf32>
    %101 = vector.shape_cast %100 : vector<32xf32> to vector<32x1xf32>
    %cst_42 = arith.constant 2.560000e+02 : f32
    %102 = vector.broadcast %cst_42 : f32 to vector<32x1xf32>
    %103 = arith.divf %101, %102 : vector<32x1xf32>
    %104 = vector.broadcast %96 : vector<32x1xf32> to vector<32x256xf32>
    %105 = arith.subf %92, %104 : vector<32x256xf32>
    %cst_43 = arith.constant 9.99999996E-13 : f32
    %106 = vector.broadcast %cst_43 : f32 to vector<32x1xf32>
    %107 = arith.addf %103, %106 : vector<32x1xf32>
    %108 = math.rsqrt %107 : vector<32x1xf32>
    %109 = vector.broadcast %108 : vector<32x1xf32> to vector<32x256xf32>
    %110 = arith.mulf %105, %109 : vector<32x256xf32>
    %c0_44 = arith.constant 0 : index
    %c0_45 = arith.constant 0 : index
    %111 = vector.load %arg13[%c0_44, %c0_45] : memref<1x256xf32, #tpu.memory_space<vmem>>, vector<1x256xf32>
    %112 = vector.broadcast %111 : vector<1x256xf32> to vector<32x256xf32>
    %113 = arith.mulf %110, %112 : vector<32x256xf32>
    %c0_46 = arith.constant 0 : index
    %c0_47 = arith.constant 0 : index
    %114 = vector.load %arg14[%c0_46, %c0_47] : memref<1x256xf32, #tpu.memory_space<vmem>>, vector<1x256xf32>
    %115 = vector.broadcast %114 : vector<1x256xf32> to vector<32x256xf32>
    %116 = arith.addf %113, %115 : vector<32x256xf32>
    %117 = vector.shape_cast %116 : vector<32x256xf32> to vector<2x16x256xf32>
    %c0_48 = arith.constant 0 : index
    %c0_49 = arith.constant 0 : index
    %c0_50 = arith.constant 0 : index
    %118 = vector.load %arg15[%c0_48, %c0_49, %c0_50] : memref<2x16x256xf32, #tpu.memory_space<vmem>>, vector<2x16x256xf32>
    tpu.vector_store %arg15[%c0_48, %c0_49, %c0_50], %117 {strides = array<i32>} : memref<2x16x256xf32, #tpu.memory_space<vmem>>, vector<2x16x256xf32>,
    return
  }
  func.func @transform_0(%arg0: i32) -> (i32, i32, i32) {
    %c0_i32 = arith.constant 0 : i32
    %c0_i32_0 = arith.constant 0 : i32
    %c0_i32_1 = arith.constant 0 : i32
    return %arg0, %c0_i32, %c0_i32_0 : i32, i32, i32
  }
  func.func @transform_1(%arg0: i32) -> (i32, i32, i32) {
    %c0_i32 = arith.constant 0 : i32
    %c0_i32_0 = arith.constant 0 : i32
    %c0_i32_1 = arith.constant 0 : i32
    %c0_i32_2 = arith.constant 0 : i32
    return %c0_i32, %c0_i32_0, %c0_i32_1 : i32, i32, i32
  }
  func.func @transform_2(%arg0: i32) -> (i32, i32) {
    %c0_i32 = arith.constant 0 : i32
    %c0_i32_0 = arith.constant 0 : i32
    %c0_i32_1 = arith.constant 0 : i32
    return %c0_i32, %c0_i32_0 : i32, i32
  }
  func.func @transform_3(%arg0: i32) -> (i32, i32) {
    %c0_i32 = arith.constant 0 : i32
    %c0_i32_0 = arith.constant 0 : i32
    %c0_i32_1 = arith.constant 0 : i32
    return %c0_i32, %c0_i32_0 : i32, i32
  }
  func.func @transform_4(%arg0: i32) -> (i32, i32) {
    %c0_i32 = arith.constant 0 : i32
    %c0_i32_0 = arith.constant 0 : i32
    %c0_i32_1 = arith.constant 0 : i32
    return %c0_i32, %c0_i32_0 : i32, i32
  }
  func.func @transform_5(%arg0: i32) -> (i32, i32) {
    %c0_i32 = arith.constant 0 : i32
    %c0_i32_0 = arith.constant 0 : i32
    %c0_i32_1 = arith.constant 0 : i32
    return %c0_i32, %c0_i32_0 : i32, i32
  }
  func.func @transform_6(%arg0: i32) -> (i32, i32) {
    %c0_i32 = arith.constant 0 : i32
    %c0_i32_0 = arith.constant 0 : i32
    %c0_i32_1 = arith.constant 0 : i32
    return %c0_i32, %c0_i32_0 : i32, i32
  }
  func.func @transform_7(%arg0: i32) -> (i32, i32) {
    %c0_i32 = arith.constant 0 : i32
    %c0_i32_0 = arith.constant 0 : i32
    %c0_i32_1 = arith.constant 0 : i32
    return %c0_i32, %c0_i32_0 : i32, i32
  }
  func.func @transform_8(%arg0: i32) -> (i32, i32) {
    %c0_i32 = arith.constant 0 : i32
    %c0_i32_0 = arith.constant 0 : i32
    %c0_i32_1 = arith.constant 0 : i32
    return %c0_i32, %c0_i32_0 : i32, i32
  }
  func.func @transform_9(%arg0: i32) -> (i32, i32) {
    %c0_i32 = arith.constant 0 : i32
    %c0_i32_0 = arith.constant 0 : i32
    %c0_i32_1 = arith.constant 0 : i32
    return %c0_i32, %c0_i32_0 : i32, i32
  }
  func.func @transform_10(%arg0: i32) -> (i32, i32) {
    %c0_i32 = arith.constant 0 : i32
    %c0_i32_0 = arith.constant 0 : i32
    %c0_i32_1 = arith.constant 0 : i32
    return %c0_i32, %c0_i32_0 : i32, i32
  }
  func.func @transform_11(%arg0: i32) -> (i32, i32) {
    %c0_i32 = arith.constant 0 : i32
    %c0_i32_0 = arith.constant 0 : i32
    %c0_i32_1 = arith.constant 0 : i32
    return %c0_i32, %c0_i32_0 : i32, i32
  }
  func.func @transform_12(%arg0: i32) -> (i32, i32) {
    %c0_i32 = arith.constant 0 : i32
    %c0_i32_0 = arith.constant 0 : i32
    %c0_i32_1 = arith.constant 0 : i32
    return %c0_i32, %c0_i32_0 : i32, i32
  }
  func.func @transform_13(%arg0: i32) -> (i32, i32) {
    %c0_i32 = arith.constant 0 : i32
    %c0_i32_0 = arith.constant 0 : i32
    %c0_i32_1 = arith.constant 0 : i32
    return %c0_i32, %c0_i32_0 : i32, i32
  }
  func.func @transform_14(%arg0: i32) -> (i32, i32, i32) {
    %c0_i32 = arith.constant 0 : i32
    %c0_i32_0 = arith.constant 0 : i32
    %c0_i32_1 = arith.constant 0 : i32
    return %arg0, %c0_i32, %c0_i32_0 : i32, i32, i32
  }
}

</mosaic_0001>

<bundles_post_ra>
// kernel: tpu_custom_call.1
= control target key start
LH: loop header
LB: loop body
LE: loop exit
PB: predicated region body
PF: predicated region fallthrough
CT: control target
= control target key end

     0   :  { %s3902_s0 = inlined_call_operand.hbm [shape: f32[4,16,256], index: 0, kind: input, shape index: {}]   ;;  %s3903_s1 = inlined_call_operand.hbm [shape: f32[1,16,16], index: 1, kind: input, shape index: {}]   ;;  %s3904_s2 = inlined_call_operand.hbm [shape: f32[16,128], index: 2, kind: input, shape index: {}]   ;;  %s3905_s3 = inlined_call_operand.hbm [shape: f32[16,128], index: 3, kind: input, shape index: {}]   ;;  %s3906_s4 = inlined_call_operand.hbm [shape: f32[256,256], index: 4, kind: input, shape index: {}]   ;;  %s3907_s5 = inlined_call_operand.vmem [shape: f32[1,256], index: 5, kind: input, shape index: {}]   ;;  %s3908_s6 = inlined_call_operand.hbm [shape: f32[256,256], index: 6, kind: input, shape index: {}]   ;;  %s3909_s7 = inlined_call_operand.vmem [shape: f32[1,256], index: 7, kind: input, shape index: {}]   ;;  %s3910_s8 = inlined_call_operand.hbm [shape: f32[256,256], index: 8, kind: input, shape index: {}]   ;;  %s3911_s9 = inlined_call_operand.vmem [shape: f32[1,256], index: 9, kind: input, shape index: {}]   ;;  %s3912_s10 = inlined_call_operand.hbm [shape: f32[256,256], index: 10, kind: input, shape index: {}]   ;;  %s3913_s11 = inlined_call_operand.vmem [shape: f32[1,256], index: 11, kind: input, shape index: {}]   ;;  %s3914_s12 = inlined_call_operand.vmem [shape: f32[1,256], index: 12, kind: input, shape index: {}]   ;;  %s3915_s13 = inlined_call_operand.vmem [shape: f32[1,256], index: 13, kind: input, shape index: {}]   ;;  %s3916_s14 = inlined_call_operand.hbm [shape: f32[4,16,256], index: 14, kind: output, shape index: {}]  }
   0x1   :  { %3923 = sst [smem:[#allocation23_spill]] %s3903_s1 }
   0x2   :  { %3924 = sst [smem:[#allocation24_spill]] %s3905_s3 }
   0x3   :  { %3925 = sst [smem:[#allocation25_spill]] %s3907_s5 }
   0x4   :  { %3926 = sst [smem:[#allocation26_spill]] %s3911_s9 }
   0x5   :  { %3927 = sst [smem:[#allocation27_spill]] %s3913_s11 }
   0x6   :  { %3928 = sst [smem:[#allocation28_spill]] %s3914_s12 }
   0x7   :  { %3929 = sst [smem:[#allocation29_spill]] %s3915_s13 }
   0x8   :  { %3930 = sst [smem:[#allocation30_spill]] %s3916_s14 }
   0x9   :  { %19 = vsyncpa [#allocation3], 0 }
   0xa   :  { %21 = vsyncpa [#allocation3 + $0x1], 0 }
   0xb   :  { %22 = vsyncpa [#allocation6], 0 }
   0xc   :  { %23 = vsyncpa [#allocation9], 0 }
   0xd   :  { %24 = vsyncpa [#allocation12], 0 }
   0xe   :  { %25 = vsyncpa [#allocation15], 0 }
   0xf   :  { %26 = vsyncpa [#allocation4], 0 }
  0x10   :  { %28 = vsyncpa [#allocation4 + $0x1], 0  ;;  %s3325_s29 = smov 0   ;;  %s3327_s30 = smov 0  }
  0x11   :  { %s3329_s15 = smov 0   ;;  %s3331_s16 = smov 0  }
  0x12 LB: > { %s3234_s17 = smov [#allocation5]   ;;  %s3346_s19 = sadd.s32 4294967295, %s3232_s16   ;;  %s3232_s16 = sphi %s3331_s16, %s3964_s16   ;;  %s3228_s15 = sphi %s3329_s15, %s3963_s15   ;;  %s3224_s30 = sphi %s3327_s30, %s3962_s30   ;;  %s3220_s29 = sphi %s3325_s29, %s3961_s29  }
  0x13   : > { %s376_s18 = sshll.u32 %s3234_s17, 4  ;;  %p2335_p0 = scmp.ge.s32.totalorder %s3232_s16, 1  ;;  %s3351_s18 = int_to_ptr.vmem [resolvable:$true] %s376_s18 }
  0x14   : > { %p3918_p1 = scmp.eq.s32.totalorder %s3346_s19, 0  ;;  %p364_p2 = scmp.lt.s32.totalorder %s3232_s16, 3 }
  0x15   : > { %s3235_s21 = smov [#allocation8]   ;;  %s3236_s24 = smov [#allocation11]  }
  0x16   : > { %p3353_p3 = pnand %p2335_p0, %p364_p2  ;;  %s402_s22 = sshll.u32 %s3235_s21, 4  ;;  %s3366_s22 = int_to_ptr.vmem [resolvable:$true] %s402_s22 }
  0x17   : > { %s3368_s25 = sshll.u32 %s3236_s24, 4  ;;  %s3933_s1 = sld [smem:[#allocation23_spill]]  ;;  %s432_s25 = int_to_ptr.vmem [resolvable:$true] %s3368_s25 }
  0x18   : > { %s3931_s20 = scalar_select %p3353_p3, 1, 0 }
  0x19   : > { %p2784_p5 = pneg %p3353_p3 }
  0x1b   : > { %p3362_p6 = pnand %p2784_p5, %p3918_p1 }
  0x1d   : > { %s2924_s28 = scalar_lea.hbm %s3933_s1, 256  ;;  %p3378_p8 = pneg %p3362_p6 }
  0x1e   : > { %p2925_p7 = scmp.ne.s32.totalorder %s3933_s1, %s2924_s28  ;;  %p2931_p11 = scmp.lt.u32.totalorder %s2924_s28, %s3933_s1 }
  0x20   : > { %p2927_p9 = pnand %p3378_p8, %p2925_p7 }
  0x22   : > { %p2928_p10 = pneg %p2927_p9 }
  0x24   : > { %p2933_p12 = pnand %p2931_p11, %p2928_p10 }
  0x26   : > { %2936 = shalt.err (!%p2933_p12)
}
  0x27   : > { %s2937_s14 = scalar_lea.vmem %s3351_s18, 256  ;;  %p2945_p5 = scmp.lt.s32.totalorder %s3351_s18, %s3351_s18 }
  0x28   : > { %p2938_p13 = scmp.ne.s32.totalorder %s3351_s18, %s2937_s14  ;;  %p2946_p4 = scmp.lt.s32.totalorder %s2937_s14, %s2937_s14 }
  0x2a   : > { %p2940_p0 = pnand %p2938_p13, %p3378_p8  ;;  %p2947_p7 = por %p2946_p4, %p2945_p5 }
  0x2c   : > { %p2941_p2 = pneg %p2940_p0 }
  0x2e   : > { %p2948_p9 = pnand %p2947_p7, %p2941_p2 }
  0x30   : > { %2951 = shalt.err (!%p2948_p9)
}
  0x31   : > { %s3920_s26 = smov 128   ;;  %s3921_s13 = smov 8  }
  0x32   : > { %2787 = dma.hbm_to_vmem [thread:$0]  (!%p3362_p6), %s3933_s1, 256, %s3351_s18, [#allocation6], %s3920_s26, %s3920_s26, %s3921_s13  }
  0x33   : > { %s3935_s3 = sld [smem:[#allocation24_spill]] }
  0x39   : > { %s2952_s14 = scalar_lea.hbm %s3935_s3, 256 }
  0x3a   : > { %p2953_p4 = scmp.ne.s32.totalorder %s3935_s3, %s2952_s14  ;;  %p2959_p12 = scmp.lt.u32.totalorder %s2952_s14, %s3935_s3 }
  0x3c   : > { %p2955_p10 = pnand %p2953_p4, %p3378_p8 }
  0x3e   : > { %p2956_p11 = pneg %p2955_p10 }
  0x40   : > { %p2961_p13 = pnand %p2959_p12, %p2956_p11 }
  0x42   : > { %2964 = shalt.err (!%p2961_p13)
}
  0x43   : > { %s2965_s18 = scalar_lea.vmem %s3366_s22, 256  ;;  %p2973_p7 = scmp.lt.s32.totalorder %s3366_s22, %s3366_s22 }
  0x44   : > { %p2966_p0 = scmp.ne.s32.totalorder %s3366_s22, %s2965_s18  ;;  %p2974_p9 = scmp.lt.s32.totalorder %s2965_s18, %s2965_s18 }
  0x46   : > { %p2968_p2 = pnand %p2966_p0, %p3378_p8  ;;  %p2975_p4 = por %p2974_p9, %p2973_p7 }
  0x48   : > { %p2969_p5 = pneg %p2968_p2 }
  0x4a   : > { %p2976_p10 = pnand %p2975_p4, %p2969_p5 }
  0x4c   : > { %2979 = shalt.err (!%p2976_p10)
}
  0x4d   : > { %2793 = dma.hbm_to_vmem [thread:$0]  (!%p3362_p6), %s3935_s3, 256, %s3366_s22, [#allocation9], %s3920_s26, %s3920_s26, %s3921_s13  }
  0x4e   : > { %s2980_s27 = scalar_lea.hbm %s3908_s6, 8192 }
  0x4f   : > { %p2981_p11 = scmp.ne.s32.totalorder %s3908_s6, %s2980_s27  ;;  %p2987_p0 = scmp.lt.u32.totalorder %s2980_s27, %s3908_s6 }
  0x51   : > { %p2983_p12 = pnand %p2981_p11, %p3378_p8 }
  0x53   : > { %p2984_p13 = pneg %p2983_p12 }
  0x55   : > { %p2989_p2 = pnand %p2987_p0, %p2984_p13 }
  0x57   : > { %2992 = shalt.err (!%p2989_p2)
}
  0x58   : > { %s2993_s18 = scalar_lea.vmem %s432_s25, 8192  ;;  %p3001_p4 = scmp.lt.s32.totalorder %s432_s25, %s432_s25 }
  0x59   : > { %p2994_p5 = scmp.ne.s32.totalorder %s432_s25, %s2993_s18  ;;  %p3002_p10 = scmp.lt.s32.totalorder %s2993_s18, %s2993_s18 }
  0x5b   : > { %p2996_p7 = pnand %p2994_p5, %p3378_p8  ;;  %p3003_p1 = por %p3002_p10, %p3001_p4 }
  0x5d   : > { %p2997_p9 = pneg %p2996_p7 }
  0x5f   : > { %p3004_p3 = pnand %p3003_p1, %p2997_p9 }
  0x61   : > { %3007 = shalt.err (!%p3004_p3)
}
  0x62   : > { %s3239_s22 = smov 256   ;;  %s3240_s5 = smov 16  }
  0x63   : > { %2799 = dma.hbm_to_vmem [thread:$0]  (!%p3362_p6), %s3908_s6, 8192, %s432_s25, [#allocation12], %s3239_s22, %s3239_s22, %s3240_s5  }
  0x64   : > { %s3241_s12 = smov [#allocation7]   ;;  %s3242_s28 = smov [#allocation10]  }
  0x65   : > { %s389_s27 = sshll.u32 %s3241_s12, 4  ;;  %s415_s17 = sshll.u32 %s3242_s28, 4  ;;  %s390_s27 = int_to_ptr.vmem [resolvable:$true] %s389_s27  ;;  %s416_s17 = int_to_ptr.vmem [resolvable:$true] %s415_s17 }
  0x66   : > { %s3008_s18 = scalar_lea.hbm %s3904_s2, 256 }
  0x67   : > { %p3009_p1 = scmp.ne.s32.totalorder %s3904_s2, %s3008_s18  ;;  %p3015_p12 = scmp.lt.u32.totalorder %s3008_s18, %s3904_s2 }
  0x69   : > { %p3011_p3 = pnand %p3009_p1, %p3378_p8 }
  0x6b   : > { %p3012_p11 = pneg %p3011_p3 }
  0x6d   : > { %p3017_p13 = pnand %p3015_p12, %p3012_p11 }
  0x6f   : > { %3020 = shalt.err (!%p3017_p13)
}
  0x70   : > { %s3021_s25 = scalar_lea.vmem %s390_s27, 256  ;;  %p3029_p7 = scmp.lt.s32.totalorder %s390_s27, %s390_s27 }
  0x71   : > { %p3022_p0 = scmp.ne.s32.totalorder %s390_s27, %s3021_s25  ;;  %p3030_p9 = scmp.lt.s32.totalorder %s3021_s25, %s3021_s25 }
  0x73   : > { %p3024_p2 = pnand %p3022_p0, %p3378_p8  ;;  %p3031_p4 = por %p3030_p9, %p3029_p7 }
  0x75   : > { %p3025_p5 = pneg %p3024_p2 }
  0x77   : > { %p3032_p10 = pnand %p3031_p4, %p3025_p5 }
  0x79   : > { %3035 = shalt.err (!%p3032_p10)
}
  0x7a   : > { %s3936_s26 = smov 8   ;;  %s3937_s13 = smov 128  }
  0x7b   : > { %2790 = dma.hbm_to_vmem [thread:$0]  (!%p3362_p6), %s3904_s2, 256, %s390_s27, [#allocation6], %s3937_s13, %s3937_s13, %s3936_s26  }
  0x7c   : > { %s3036_s12 = scalar_lea.hbm %s3906_s4, 8192 }
  0x7d   : > { %p3037_p1 = scmp.ne.s32.totalorder %s3906_s4, %s3036_s12  ;;  %p3043_p12 = scmp.lt.u32.totalorder %s3036_s12, %s3906_s4 }
  0x7f   : > { %p3039_p3 = pnand %p3037_p1, %p3378_p8 }
  0x81   : > { %p3040_p11 = pneg %p3039_p3 }
  0x83   : > { %p3045_p13 = pnand %p3043_p12, %p3040_p11 }
  0x85   : > { %3048 = shalt.err (!%p3045_p13)
}
  0x86   : > { %s3049_s25 = scalar_lea.vmem %s416_s17, 8192  ;;  %p3057_p7 = scmp.lt.s32.totalorder %s416_s17, %s416_s17 }
  0x87   : > { %p3050_p0 = scmp.ne.s32.totalorder %s416_s17, %s3049_s25  ;;  %p3058_p9 = scmp.lt.s32.totalorder %s3049_s25, %s3049_s25 }
  0x89   : > { %p3052_p2 = pnand %p3050_p0, %p3378_p8  ;;  %p3059_p4 = por %p3058_p9, %p3057_p7 }
  0x8b   : > { %p3053_p5 = pneg %p3052_p2 }
  0x8d   : > { %p3060_p10 = pnand %p3059_p4, %p3053_p5 }
  0x8f   : > { %3063 = shalt.err (!%p3060_p10)
}
  0x90   : > { %2796 = dma.hbm_to_vmem [thread:$0]  (!%p3362_p6), %s3906_s4, 8192, %s416_s17, [#allocation9], %s3239_s22, %s3239_s22, %s3240_s5  }
  0x91   : > { %s3243_s13 = smov [#allocation13]   ;;  %s3244_s3 = smov [#allocation14]  }
  0x92   : > { %s447_s1 = sshll.u32 %s3243_s13, 4  ;;  %s463_s9 = sshll.u32 %s3244_s3, 4  ;;  %s448_s1 = int_to_ptr.vmem [resolvable:$true] %s447_s1  ;;  %s464_s9 = int_to_ptr.vmem [resolvable:$true] %s463_s9 }
  0x93   : > { %s3064_s28 = scalar_lea.hbm %s3910_s8, 8192 }
  0x94   : > { %p3065_p1 = scmp.ne.s32.totalorder %s3910_s8, %s3064_s28  ;;  %p3071_p12 = scmp.lt.u32.totalorder %s3064_s28, %s3910_s8 }
  0x96   : > { %p3067_p3 = pnand %p3065_p1, %p3378_p8 }
  0x98   : > { %p3068_p11 = pneg %p3067_p3 }
  0x9a   : > { %p3073_p13 = pnand %p3071_p12, %p3068_p11 }
  0x9c   : > { %3076 = shalt.err (!%p3073_p13)
}
  0x9d   : > { %s3077_s17 = scalar_lea.vmem %s448_s1, 8192  ;;  %p3085_p7 = scmp.lt.s32.totalorder %s448_s1, %s448_s1 }
  0x9e   : > { %p3078_p0 = scmp.ne.s32.totalorder %s448_s1, %s3077_s17  ;;  %p3086_p9 = scmp.lt.s32.totalorder %s3077_s17, %s3077_s17 }
  0xa0   : > { %p3080_p2 = pnand %p3078_p0, %p3378_p8  ;;  %p3087_p4 = por %p3086_p9, %p3085_p7 }
  0xa2   : > { %p3081_p5 = pneg %p3080_p2 }
  0xa4   : > { %p3088_p10 = pnand %p3087_p4, %p3081_p5 }
  0xa6   : > { %3091 = shalt.err (!%p3088_p10)
}
  0xa7   : > { %2802 = dma.hbm_to_vmem [thread:$0]  (!%p3362_p6), %s3910_s8, 8192, %s448_s1, [#allocation12], %s3239_s22, %s3239_s22, %s3240_s5  }
  0xa8   : > { %s3092_s11 = scalar_lea.hbm %s3912_s10, 8192 }
  0xa9   : > { %p3093_p1 = scmp.ne.s32.totalorder %s3912_s10, %s3092_s11  ;;  %p3099_p12 = scmp.lt.u32.totalorder %s3092_s11, %s3912_s10 }
  0xab   : > { %p3095_p3 = pnand %p3093_p1, %p3378_p8 }
  0xad   : > { %p3096_p11 = pneg %p3095_p3 }
  0xaf   : > { %p3101_p13 = pnand %p3099_p12, %p3096_p11 }
  0xb1   : > { %3104 = shalt.err (!%p3101_p13)
}
  0xb2   : > { %s3105_s18 = scalar_lea.vmem %s464_s9, 8192  ;;  %p3113_p7 = scmp.lt.s32.totalorder %s464_s9, %s464_s9 }
  0xb3   : > { %p3106_p0 = scmp.ne.s32.totalorder %s464_s9, %s3105_s18  ;;  %p3114_p9 = scmp.lt.s32.totalorder %s3105_s18, %s3105_s18 }
  0xb5   : > { %p3108_p2 = pnand %p3106_p0, %p3378_p8  ;;  %p3115_p4 = por %p3114_p9, %p3113_p7 }
  0xb7   : > { %p3109_p5 = pneg %p3108_p2 }
  0xb9   : > { %p3116_p10 = pnand %p3115_p4, %p3109_p5 }
  0xbb   : > { %3119 = shalt.err (!%p3116_p10)
}
  0xbc   : > { %2805 = dma.hbm_to_vmem [thread:$0]  (!%p3362_p6), %s3912_s10, 8192, %s464_s9, [#allocation15], %s3239_s22, %s3239_s22, %s3240_s5  }
  0xbd   : > { %s2334_s23 = sadd.s32 4294967294, %s3232_s16   ;;  %s3536_s21 = sadd.s32 1, %s3232_s16  }
  0xbe   : > { %s41_s17 = sadd.s32 1, %s3228_s15  ;;  %s38_s27 = ssub.s32 %s3232_s16, %s3536_s21 }
  0xbf   : > { %p48_p8 = scmp.ne.s32.totalorder %s3228_s15, %s3224_s30  ;;  %p39_p1 = scmp.eq.s32.totalorder %s38_s27, 0 }
  0xc0   : > { %p49_p3 = scmp.eq.s32.totalorder %s3232_s16, 0  ;;  %p54_p11 = scmp.ne.s32.totalorder %s3224_s30, %s3220_s29 }
  0xc1   : > { %p351_p12 = scmp.eq.s32.totalorder %s3346_s19, 1  ;;  %p3938_p0 = scmp.eq.s32.totalorder %s3346_s19, 0 }
  0xc2   : > { %s3548_s26 = scalar_select %p39_p1, %s3228_s15, %s41_s17  }
  0xc3   : > { %p50_p13 = por %p49_p3, %p48_p8  ;;  %p3552_p2 = por %p3938_p0, %p54_p11 }
  0xc4   : > { %p3556_p6 = por %p351_p12, %p48_p8  ;;  %p357_p5 = scmp.eq.s32.totalorder %s2334_s23, 1 }
  0xc5   : > { %p2821_p7 = scmp.lt.s32.totalorder %s3232_s16, 2  ;;  %s486_s3 = sand.u32 1, %s3228_s15  }
  0xc6   : > { %s3940_s9 = scalar_select %p3556_p6, 1, 0 }
  0xc7   : > { %p3562_p9 = por %p357_p5, %p54_p11  ;;  %s2344_s12 = sshll.u32 %s486_s3, 6 }
  0xc8   : > { %s2373_s28 = sshll.u32 %s3232_s16, 10  ;;  %s490_s1 = scalar_lea.vmem [#allocation2], %s2344_s12 }
  0xc9   : > { %s3941_s11 = scalar_select %p3562_p9, 1, 0 }
  0xca   : > { %s3570_s18 = scalar_lea.hbm %s3902_s0, %s2373_s28  ;;  %s498_s25 = sshll.u32 %s490_s1, 4  ;;  %s3576_s25 = int_to_ptr.vmem [resolvable:$true] %s498_s25 }
  0xcb   : > { %p3572_p4 = pnand %p2821_p7, %p50_p13  ;;  %s3578_s17 = scalar_lea.sflag [#allocation3], %s486_s3 }
  0xcc   : > { %s3120_s27 = scalar_lea.hbm %s3570_s18, 1024  ;;  %s3125_s24 = scalar_lea.hbm %s3902_s0, 2048 }
  0xcd   : > { %p3121_p10 = scmp.ne.s32.totalorder %s3570_s18, %s3120_s27  ;;  %p3122_p8 = pneg %p3572_p4 }
  0xce   : > { %p3126_p11 = scmp.lt.u32.totalorder %s3570_s18, %s3902_s0  ;;  %p3127_p12 = scmp.lt.u32.totalorder %s3125_s24, %s3120_s27 }
  0xcf   : > { %p3123_p1 = pnand %p3122_p8, %p3121_p10  ;;  %p3129_p0 = scmp.lt.u32.totalorder %s3120_s27, %s3570_s18 }
  0xd0   : > { %p3128_p13 = por %p3127_p12, %p3126_p11 }
  0xd1   : > { %p3124_p3 = pneg %p3123_p1 }
  0xd2   : > { %p3130_p5 = por %p3129_p0, %p3128_p13 }
  0xd4   : > { %p3131_p7 = pnand %p3130_p5, %p3124_p3 }
  0xd6   : > { %3134 = shalt.err (!%p3131_p7)
}
  0xd7   : > { %s3135_s3 = scalar_lea.vmem %s3576_s25, 1024  ;;  %s3245_s12 = smov [#allocation2]  }
  0xd8   : > { %p3136_p10 = scmp.ne.s32.totalorder %s3576_s25, %s3135_s3  ;;  %s3140_s28 = sshll.u32 %s3245_s12, 4  ;;  %s3141_s28 = int_to_ptr.vmem [resolvable:$false] %s3140_s28 }
  0xd9   : > { %s3142_s14 = scalar_lea.vmem %s3141_s28, 2048  ;;  %p3143_p6 = scmp.lt.s32.totalorder %s3576_s25, %s3141_s28 }
  0xda   : > { %p3138_p1 = pnand %p3136_p10, %p3122_p8  ;;  %p3144_p11 = scmp.lt.s32.totalorder %s3142_s14, %s3135_s3 }
  0xdc   : > { %p3139_p9 = pneg %p3138_p1  ;;  %p3145_p12 = por %p3144_p11, %p3143_p6 }
  0xde   : > { %p3146_p13 = pnand %p3145_p12, %p3139_p9 }
  0xe0   : > { %3149 = shalt.err (!%p3146_p13)
}
  0xe1   : > { %2809 = dma.hbm_to_vmem [thread:$0]  (!%p3572_p4), %s3570_s18, 1024, %s3576_s25, %s3578_s17, %s3239_s22, %s3239_s22, %s3240_s5  }
  0xe2   : > { %p3943_p8 = scmp.ne.s32.totalorder %s3931_s20, 0 }
  0xe3   : > { %s3612_s27 = sand.u32 (!%p3943_p8), 1, %s3224_s30  }
  0xe4   : > { %510 = sbr.rel (%p3943_p8) target bundleno = 1984 (0x7c0), region = 76  ;;  %s2349_s24 = sshll.u32 (!%p3943_p8), %s3612_s27, 6 }
  0xe5   : > { %s513_s1 = scalar_lea.sflag (!%p3943_p8), [#allocation3], %s3612_s27  ;;  %s3618_s23 = scalar_lea.vmem (!%p3943_p8), [#allocation2], %s2349_s24 }
  0xeb   : > { %3195 = dma.done.wait (%p3552_p2), %s513_s1, 1024  }
  0xec   : > { %3197 = vsyncadd (%p3552_p2), %s513_s1, 4294966272  ;;  %p3944_p6 = scmp.eq.s32.totalorder %s3346_s19, 0 }
  0xee   : > { %3199 = dma.done.wait (%p3944_p6), [#allocation6], 512   ;;  %p3945_p9 = pmov %p3944_p6 }
  0xef   : > { %p3946_p4 = pmov %p3944_p6 }
  0xf0   : > { %3201 = vsyncadd (%p3945_p9), [#allocation6], 4294966784 }
  0xf1   : > { %3203 = dma.done.wait (%p3946_p4), [#allocation9], 8448   ;;  %p3947_p3 = pmov %p3946_p4 }
  0xf3   : > { %3205 = vsyncadd (%p3947_p3), [#allocation9], 4294958848  ;;  %p3948_p0 = pmov %p3947_p3 }
  0xf5   : > { %3207 = dma.done.wait (%p3948_p0), [#allocation12], 16384   ;;  %p3949_p5 = pmov %p3948_p0 }
  0xf6   : > { %p3950_p2 = pmov %p3948_p0 }
  0xf7   : > { %3209 = vsyncadd (%p3949_p5), [#allocation12], 4294950912 }
  0xf8   : > { %3211 = dma.done.wait (%p3950_p2), [#allocation15], 8192   ;;  %p3951_p7 = pmov %p3948_p0 }
  0xf9   : > { %v771_v0 = vld [vmem:[#allocation11 + $0x8] sm:$0xff]  ;;  %v773_v1 = vld [vmem:[#allocation11 + $0x18] sm:$0xff]  ;;  %v770_v2 = vld [vmem:[#allocation11] sm:$0xff]  ;;  %s3952_s18 = sld [smem:[#allocation25_spill]]  ;;  %s3246_s25 = smov 64   ;;  %vm1290_vm0 = vcmask 130048  }
  0xfa   : > { %3213 = vsyncadd (%p3951_p7), [#allocation15], 4294959104  ;;  %v2528_v3 = vpack.c.bf16 %v773_v1, %v771_v0  ;;  %v772_v4 = vld [vmem:[#allocation11 + $0x10] sm:$0xff]  ;;  %v775_v5 = vld [vmem:[#allocation11 + $0x28] sm:$0xff]  ;;  %s3953_s12 = sld [smem:[#allocation26_spill]]  ;;  %s3954_s1 = sld [smem:[#allocation27_spill]] }
  0xfb   : > { %v777_v6 = vld [vmem:[#allocation11 + $0x38] sm:$0xff]  ;;  %v2530_v7 = vpack.c.bf16 %v772_v4, %v770_v2  ;;  %v774_v9 = vld [vmem:[#allocation11 + $0x20] sm:$0xff]  ;;  %v776_v10 = vld [vmem:[#allocation11 + $0x30] sm:$0xff]  ;;  %s3955_s22 = sld [smem:[#allocation28_spill]]  ;;  %s3957_s28 = sld [smem:[#allocation30_spill]] }
  0xfc   : > { %v2532_v8 = vpack.c.bf16 %v777_v6, %v775_v5  ;;  %v606_v11 = vld [vmem:[#allocation10 + $0x8] sm:$0xff]  ;;  %2529 = vmatprep.subr.bf16.mxu1 %v2528_v3  ;;  %v608_v12 = vld [vmem:[#allocation10 + $0x18] sm:$0xff]  ;;  %v2534_v15 = vpack.c.bf16 %v776_v10, %v774_v9  ;;  %v605_v17 = vld [vmem:[#allocation10] sm:$0xff]  ;;  %p3958_p1 = scmp.ne.s32.totalorder %s3940_s9, 0 }
  0xfd   : > { %v779_v13 = vld [vmem:[#allocation11 + $0x48] sm:$0xff]  ;;  %v781_v14 = vld [vmem:[#allocation11 + $0x58] sm:$0xff]  ;;  %2531 = vmatpush1.bf16.msra.mxu1 %v2530_v7  ;;  %v2464_v16 = vpack.c.bf16 %v608_v12, %v606_v11  ;;  %v607_v18 = vld [vmem:[#allocation10 + $0x10] sm:$0xff] }
  0xfe   : > { %v778_v19 = vld [vmem:[#allocation11 + $0x40] sm:$0xff]  ;;  %2533 = vmatprep.subr.bf16.mxu1 %v2532_v8  ;;  %v2536_v20 = vpack.c.bf16 %v781_v14, %v779_v13  ;;  %v2466_v21 = vpack.c.bf16 %v607_v18, %v605_v17  ;;  %v780_v22 = vld [vmem:[#allocation11 + $0x50] sm:$0xff]  ;;  %v610_v23 = vld [vmem:[#allocation10 + $0x28] sm:$0xff] }
  0xff   : > { %v612_v24 = vld [vmem:[#allocation10 + $0x38] sm:$0xff]  ;;  %2465 = vmatprep.subr.bf16.mxu0 %v2464_v16  ;;  %v783_v26 = vld [vmem:[#allocation11 + $0x68] sm:$0xff]  ;;  %v609_v28 = vld [vmem:[#allocation10 + $0x20] sm:$0xff]  ;;  %v2538_v30 = vpack.c.bf16 %v780_v22, %v778_v19 }
 0x100   : > { %v2468_v25 = vpack.c.bf16 %v612_v24, %v610_v23  ;;  %v785_v27 = vld [vmem:[#allocation11 + $0x78] sm:$0xff]  ;;  %2467 = vmatpush1.bf16.msra.mxu0 %v2466_v21  ;;  %v611_v29 = vld [vmem:[#allocation10 + $0x30] sm:$0xff]  ;;  %v782_v32 = vld [vmem:[#allocation11 + $0x60] sm:$0xff] }
 0x101   : > { %2535 = vmatpush1.bf16.msra.mxu1 %v2534_v15  ;;  %v2470_v31 = vpack.c.bf16 %v611_v29, %v609_v28  ;;  %v614_v33 = vld [vmem:[#allocation10 + $0x48] sm:$0xff]  ;;  %v616_v34 = vld [vmem:[#allocation10 + $0x58] sm:$0xff]  ;;  %v2540_v35 = vpack.c.bf16 %v785_v27, %v783_v26  ;;  %v784_v36 = vld [vmem:[#allocation11 + $0x70] sm:$0xff] }
 0x102   : > { %2469 = vmatprep.subr.bf16.mxu0 %v2468_v25  ;;  %2537 = vmatprep.subr.bf16.mxu1 %v2536_v20  ;;  %v2472_v37 = vpack.c.bf16 %v616_v34, %v614_v33  ;;  %v613_v38 = vld [vmem:[#allocation10 + $0x40] sm:$0xff]  ;;  %v615_v39 = vld [vmem:[#allocation10 + $0x50] sm:$0xff]  ;;  %v787_v40 = vld [vmem:[#allocation11 + $0x88] sm:$0xff]  ;;  %v2542_v45 = vpack.c.bf16 %v784_v36, %v782_v32 }
 0x103   : > { %v789_v41 = vld [vmem:[#allocation11 + $0x98] sm:$0xff]  ;;  %v618_v42 = vld [vmem:[#allocation10 + $0x68] sm:$0xff]  ;;  %v2474_v43 = vpack.c.bf16 %v615_v39, %v613_v38  ;;  %v786_v46 = vld [vmem:[#allocation11 + $0x80] sm:$0xff] }
 0x104   : > { %2471 = vmatpush1.bf16.msra.mxu0 %v2470_v31  ;;  %v620_v44 = vld [vmem:[#allocation10 + $0x78] sm:$0xff]  ;;  %v617_v48 = vld [vmem:[#allocation10 + $0x60] sm:$0xff]  ;;  %v619_v49 = vld [vmem:[#allocation10 + $0x70] sm:$0xff]  ;;  %v2544_v50 = vpack.c.bf16 %v789_v41, %v787_v40 }
 0x105   : > { %2539 = vmatpush1.bf16.msra.mxu1 %v2538_v30  ;;  %2473 = vmatprep.subr.bf16.mxu0 %v2472_v37  ;;  %v2476_v47 = vpack.c.bf16 %v620_v44, %v618_v42  ;;  %v788_v51 = vld [vmem:[#allocation11 + $0x90] sm:$0xff]  ;;  %v622_v52 = vld [vmem:[#allocation10 + $0x88] sm:$0xff]  ;;  %v624_v53 = vld [vmem:[#allocation10 + $0x98] sm:$0xff]  ;;  %v2478_v56 = vpack.c.bf16 %v619_v49, %v617_v48 }
 0x106   : > { %2541 = vmatprep.subr.bf16.mxu1 %v2540_v35  ;;  %v791_v54 = vld [vmem:[#allocation11 + $0xa8] sm:$0xff]  ;;  %v793_v55 = vld [vmem:[#allocation11 + $0xb8] sm:$0xff]  ;;  %v2546_v57 = vpack.c.bf16 %v788_v51, %v786_v46  ;;  %v790_v58 = vld [vmem:[#allocation11 + $0xa0] sm:$0xff]  ;;  %v2480_v59 = vpack.c.bf16 %v624_v53, %v622_v52 }
 0x107   : > { %v621_v60 = vld [vmem:[#allocation10 + $0x80] sm:$0xff]  ;;  %v623_v61 = vld [vmem:[#allocation10 + $0x90] sm:$0xff]  ;;  %v2548_v62 = vpack.c.bf16 %v793_v55, %v791_v54  ;;  %v626_v0 = vld [vmem:[#allocation10 + $0xa8] sm:$0xff] }
 0x108   : > { %2475 = vmatpush1.bf16.msra.mxu0 %v2474_v43  ;;  %v792_v63 = vld [vmem:[#allocation11 + $0xb0] sm:$0xff]  ;;  %v628_v1 = vld [vmem:[#allocation10 + $0xb8] sm:$0xff]  ;;  %v795_v2 = vld [vmem:[#allocation11 + $0xc8] sm:$0xff]  ;;  %v2482_v4 = vpack.c.bf16 %v623_v61, %v621_v60 }
 0x109   : > { %2543 = vmatpush1.bf16.msra.mxu1 %v2542_v45  ;;  %2477 = vmatprep.subr.bf16.mxu0 %v2476_v47  ;;  %v797_v3 = vld [vmem:[#allocation11 + $0xd8] sm:$0xff]  ;;  %v2550_v5 = vpack.c.bf16 %v792_v63, %v790_v58  ;;  %v794_v6 = vld [vmem:[#allocation11 + $0xc0] sm:$0xff]  ;;  %v2484_v7 = vpack.c.bf16 %v628_v1, %v626_v0  ;;  %v627_v9 = vld [vmem:[#allocation10 + $0xb0] sm:$0xff] }
 0x10a   : > { %2545 = vmatprep.subr.bf16.mxu1 %v2544_v50  ;;  %v625_v8 = vld [vmem:[#allocation10 + $0xa0] sm:$0xff]  ;;  %v2552_v10 = vpack.c.bf16 %v797_v3, %v795_v2  ;;  %v796_v11 = vld [vmem:[#allocation11 + $0xd0] sm:$0xff]  ;;  %v630_v12 = vld [vmem:[#allocation10 + $0xc8] sm:$0xff] }
 0x10b   : > { %v632_v13 = vld [vmem:[#allocation10 + $0xd8] sm:$0xff]  ;;  %v799_v14 = vld [vmem:[#allocation11 + $0xe8] sm:$0xff]  ;;  %v2486_v16 = vpack.c.bf16 %v627_v9, %v625_v8  ;;  %v2554_v17 = vpack.c.bf16 %v796_v11, %v794_v6  ;;  %v798_v18 = vld [vmem:[#allocation11 + $0xe0] sm:$0xff] }
 0x10c   : > { %2479 = vmatpush1.bf16.msra.mxu0 %v2478_v56  ;;  %v801_v15 = vld [vmem:[#allocation11 + $0xf8] sm:$0xff]  ;;  %v2488_v19 = vpack.c.bf16 %v632_v13, %v630_v12  ;;  %v629_v20 = vld [vmem:[#allocation10 + $0xc0] sm:$0xff]  ;;  %v631_v21 = vld [vmem:[#allocation10 + $0xd0] sm:$0xff] }
 0x10d   : > { %2547 = vmatpush1.bf16.msra.mxu1 %v2546_v57  ;;  %2481 = vmatprep.subr.bf16.mxu0 %v2480_v59  ;;  %v2556_v22 = vpack.c.bf16 %v801_v15, %v799_v14  ;;  %v800_v23 = vld [vmem:[#allocation11 + $0xf0] sm:$0xff]  ;;  %v634_v24 = vld [vmem:[#allocation10 + $0xe8] sm:$0xff]  ;;  %v636_v25 = vld [vmem:[#allocation10 + $0xf8] sm:$0xff]  ;;  %v2490_v28 = vpack.c.bf16 %v631_v21, %v629_v20 }
 0x10e   : > { %2549 = vmatprep.subr.bf16.mxu1 %v2548_v62  ;;  %v803_v26 = vld [vmem:[#allocation11 + $0x108] sm:$0xff]  ;;  %v805_v27 = vld [vmem:[#allocation11 + $0x118] sm:$0xff]  ;;  %v2558_v29 = vpack.c.bf16 %v800_v23, %v798_v18  ;;  %v802_v30 = vld [vmem:[#allocation11 + $0x100] sm:$0xff]  ;;  %v2492_v31 = vpack.c.bf16 %v636_v25, %v634_v24 }
 0x10f   : > { %v633_v32 = vld [vmem:[#allocation10 + $0xe0] sm:$0xff]  ;;  %v635_v33 = vld [vmem:[#allocation10 + $0xf0] sm:$0xff]  ;;  %v2560_v34 = vpack.c.bf16 %v805_v27, %v803_v26  ;;  %v638_v36 = vld [vmem:[#allocation10 + $0x108] sm:$0xff] }
 0x110   : > { %2483 = vmatpush1.bf16.msra.mxu0 %v2482_v4  ;;  %v804_v35 = vld [vmem:[#allocation11 + $0x110] sm:$0xff]  ;;  %v640_v37 = vld [vmem:[#allocation10 + $0x118] sm:$0xff]  ;;  %v807_v38 = vld [vmem:[#allocation11 + $0x128] sm:$0xff]  ;;  %v2494_v40 = vpack.c.bf16 %v635_v33, %v633_v32 }
 0x111   : > { %2551 = vmatpush1.bf16.msra.mxu1 %v2550_v5  ;;  %2485 = vmatprep.subr.bf16.mxu0 %v2484_v7  ;;  %v809_v39 = vld [vmem:[#allocation11 + $0x138] sm:$0xff]  ;;  %v2562_v41 = vpack.c.bf16 %v804_v35, %v802_v30  ;;  %v806_v42 = vld [vmem:[#allocation11 + $0x120] sm:$0xff]  ;;  %v2496_v43 = vpack.c.bf16 %v640_v37, %v638_v36  ;;  %v639_v45 = vld [vmem:[#allocation10 + $0x110] sm:$0xff] }
 0x112   : > { %2553 = vmatprep.subr.bf16.mxu1 %v2552_v10  ;;  %v637_v44 = vld [vmem:[#allocation10 + $0x100] sm:$0xff]  ;;  %v2564_v46 = vpack.c.bf16 %v809_v39, %v807_v38  ;;  %v808_v47 = vld [vmem:[#allocation11 + $0x130] sm:$0xff]  ;;  %v642_v48 = vld [vmem:[#allocation10 + $0x128] sm:$0xff] }
 0x113   : > { %v644_v49 = vld [vmem:[#allocation10 + $0x138] sm:$0xff]  ;;  %v811_v50 = vld [vmem:[#allocation11 + $0x148] sm:$0xff]  ;;  %v2498_v52 = vpack.c.bf16 %v639_v45, %v637_v44  ;;  %v2566_v53 = vpack.c.bf16 %v808_v47, %v806_v42  ;;  %v810_v54 = vld [vmem:[#allocation11 + $0x140] sm:$0xff] }
 0x114   : > { %2487 = vmatpush1.bf16.msra.mxu0 %v2486_v16  ;;  %v813_v51 = vld [vmem:[#allocation11 + $0x158] sm:$0xff]  ;;  %v2500_v55 = vpack.c.bf16 %v644_v49, %v642_v48  ;;  %v641_v56 = vld [vmem:[#allocation10 + $0x120] sm:$0xff]  ;;  %v643_v57 = vld [vmem:[#allocation10 + $0x130] sm:$0xff] }
 0x115   : > { %2555 = vmatpush1.bf16.msra.mxu1 %v2554_v17  ;;  %2489 = vmatprep.subr.bf16.mxu0 %v2488_v19  ;;  %v2568_v58 = vpack.c.bf16 %v813_v51, %v811_v50  ;;  %v812_v59 = vld [vmem:[#allocation11 + $0x150] sm:$0xff]  ;;  %v646_v60 = vld [vmem:[#allocation10 + $0x148] sm:$0xff]  ;;  %v648_v61 = vld [vmem:[#allocation10 + $0x158] sm:$0xff]  ;;  %v2502_v0 = vpack.c.bf16 %v643_v57, %v641_v56 }
 0x116   : > { %2557 = vmatprep.subr.bf16.mxu1 %v2556_v22  ;;  %v815_v62 = vld [vmem:[#allocation11 + $0x168] sm:$0xff]  ;;  %v817_v63 = vld [vmem:[#allocation11 + $0x178] sm:$0xff]  ;;  %v814_v1 = vld [vmem:[#allocation11 + $0x160] sm:$0xff]  ;;  %v2570_v2 = vpack.c.bf16 %v812_v59, %v810_v54  ;;  %v2504_v3 = vpack.c.bf16 %v648_v61, %v646_v60 }
 0x117   : > { %v645_v4 = vld [vmem:[#allocation10 + $0x140] sm:$0xff]  ;;  %v647_v5 = vld [vmem:[#allocation10 + $0x150] sm:$0xff]  ;;  %v3641_v6 = vld [vmem:[%s3618_s23 + $0x8] sm:$0xff]  ;;  %v2572_v7 = vpack.c.bf16 %v817_v63, %v815_v62 }
 0x118   : > { %2491 = vmatpush1.bf16.msra.mxu0 %v2490_v28  ;;  %v816_v8 = vld [vmem:[#allocation11 + $0x170] sm:$0xff]  ;;  %v650_v9 = vld [vmem:[#allocation10 + $0x168] sm:$0xff]  ;;  %v652_v10 = vld [vmem:[#allocation10 + $0x178] sm:$0xff]  ;;  %910 = vmatprep.mubr.f32.mxu1 %v3641_v6  ;;  %v2506_v13 = vpack.c.bf16 %v647_v5, %v645_v4 }
 0x119   : > { %2559 = vmatpush1.bf16.msra.mxu1 %v2558_v29  ;;  %2493 = vmatprep.subr.bf16.mxu0 %v2492_v31  ;;  %v819_v11 = vld [vmem:[#allocation11 + $0x188] sm:$0xff]  ;;  %v821_v12 = vld [vmem:[#allocation11 + $0x198] sm:$0xff]  ;;  %v2574_v14 = vpack.c.bf16 %v816_v8, %v814_v1  ;;  %v818_v15 = vld [vmem:[#allocation11 + $0x180] sm:$0xff]  ;;  %v2508_v16 = vpack.c.bf16 %v652_v10, %v650_v9 }
 0x11a   : > { %2561 = vmatprep.subr.bf16.mxu1 %v2560_v34  ;;  %745 = vmatprep.mubr.f32.mxu0 %v3641_v6  ;;  %v649_v17 = vld [vmem:[#allocation10 + $0x160] sm:$0xff]  ;;  %v651_v18 = vld [vmem:[#allocation10 + $0x170] sm:$0xff]  ;;  %v2576_v19 = vpack.c.bf16 %v821_v12, %v819_v11  ;;  %v654_v21 = vld [vmem:[#allocation10 + $0x188] sm:$0xff] }
 0x11b   : > { %v820_v20 = vld [vmem:[#allocation11 + $0x190] sm:$0xff]  ;;  %v656_v22 = vld [vmem:[#allocation10 + $0x198] sm:$0xff]  ;;  %v823_v23 = vld [vmem:[#allocation11 + $0x1a8] sm:$0xff]  ;;  %v2510_v25 = vpack.c.bf16 %v651_v18, %v649_v17 }
 0x11c   : > { %2495 = vmatpush1.bf16.msra.mxu0 %v2494_v40  ;;  %v825_v24 = vld [vmem:[#allocation11 + $0x1b8] sm:$0xff]  ;;  %v2578_v26 = vpack.c.bf16 %v820_v20, %v818_v15  ;;  %v822_v27 = vld [vmem:[#allocation11 + $0x1a0] sm:$0xff]  ;;  %v2512_v28 = vpack.c.bf16 %v656_v22, %v654_v21  ;;  %v655_v30 = vld [vmem:[#allocation10 + $0x190] sm:$0xff] }
 0x11d   : > { %2563 = vmatpush1.bf16.msra.mxu1 %v2562_v41  ;;  %2497 = vmatprep.subr.bf16.mxu0 %v2496_v43  ;;  %v653_v29 = vld [vmem:[#allocation10 + $0x180] sm:$0xff]  ;;  %v2580_v31 = vpack.c.bf16 %v825_v24, %v823_v23  ;;  %v824_v32 = vld [vmem:[#allocation11 + $0x1b0] sm:$0xff]  ;;  %v658_v33 = vld [vmem:[#allocation10 + $0x1a8] sm:$0xff] }
 0x11e   : > { %2565 = vmatprep.subr.bf16.mxu1 %v2564_v46  ;;  %v660_v34 = vld [vmem:[#allocation10 + $0x1b8] sm:$0xff]  ;;  %v827_v35 = vld [vmem:[#allocation11 + $0x1c8] sm:$0xff]  ;;  %v2514_v37 = vpack.c.bf16 %v655_v30, %v653_v29  ;;  %v2582_v38 = vpack.c.bf16 %v824_v32, %v822_v27  ;;  %v826_v39 = vld [vmem:[#allocation11 + $0x1c0] sm:$0xff] }
 0x11f   : > { %v829_v36 = vld [vmem:[#allocation11 + $0x1d8] sm:$0xff]  ;;  %v2516_v40 = vpack.c.bf16 %v660_v34, %v658_v33  ;;  %v657_v41 = vld [vmem:[#allocation10 + $0x1a0] sm:$0xff]  ;;  %v659_v42 = vld [vmem:[#allocation10 + $0x1b0] sm:$0xff] }
 0x120   : > { %2499 = vmatpush1.bf16.msra.mxu0 %v2498_v52  ;;  %v2584_v43 = vpack.c.bf16 %v829_v36, %v827_v35  ;;  %v828_v44 = vld [vmem:[#allocation11 + $0x1d0] sm:$0xff]  ;;  %v662_v45 = vld [vmem:[#allocation10 + $0x1c8] sm:$0xff]  ;;  %v664_v46 = vld [vmem:[#allocation10 + $0x1d8] sm:$0xff]  ;;  %v2518_v49 = vpack.c.bf16 %v659_v42, %v657_v41 }
 0x121   : > { %2567 = vmatpush1.bf16.msra.mxu1 %v2566_v53  ;;  %2501 = vmatprep.subr.bf16.mxu0 %v2500_v55  ;;  %v831_v47 = vld [vmem:[#allocation11 + $0x1e8] sm:$0xff]  ;;  %v833_v48 = vld [vmem:[#allocation11 + $0x1f8] sm:$0xff]  ;;  %v2586_v50 = vpack.c.bf16 %v828_v44, %v826_v39  ;;  %v830_v51 = vld [vmem:[#allocation11 + $0x1e0] sm:$0xff]  ;;  %v2520_v52 = vpack.c.bf16 %v664_v46, %v662_v45 }
 0x122   : > { %2569 = vmatprep.subr.bf16.mxu1 %v2568_v58  ;;  %v661_v53 = vld [vmem:[#allocation10 + $0x1c0] sm:$0xff]  ;;  %v663_v54 = vld [vmem:[#allocation10 + $0x1d0] sm:$0xff]  ;;  %v2588_v55 = vpack.c.bf16 %v833_v48, %v831_v47  ;;  %v666_v57 = vld [vmem:[#allocation10 + $0x1e8] sm:$0xff] }
 0x123   : > { %v832_v56 = vld [vmem:[#allocation11 + $0x1f0] sm:$0xff]  ;;  %v668_v58 = vld [vmem:[#allocation10 + $0x1f8] sm:$0xff]  ;;  %v2522_v59 = vpack.c.bf16 %v663_v54, %v661_v53  ;;  %v665_v62 = vld [vmem:[#allocation10 + $0x1e0] sm:$0xff] }
 0x124   : > { %2503 = vmatpush1.bf16.msra.mxu0 %v2502_v0  ;;  %v2590_v60 = vpack.c.bf16 %v832_v56, %v830_v51  ;;  %v2524_v61 = vpack.c.bf16 %v668_v58, %v666_v57  ;;  %v667_v63 = vld [vmem:[#allocation10 + $0x1f0] sm:$0xff]  ;;  %v3657_v4 = vld [vmem:[%s3618_s23 + $0x28] sm:$0xff]  ;;  %v3674_v8 = vld [vmem:[%s3618_s23 + $0x30] sm:$0xff] }
 0x125   : > { %2571 = vmatpush1.bf16.msra.mxu1 %v2570_v2  ;;  %2505 = vmatprep.subr.bf16.mxu0 %v2504_v3  ;;  %v2526_v0 = vpack.c.bf16 %v667_v63, %v665_v62  ;;  %v3646_v1 = vld [vmem:[%s3618_s23] sm:$0xff]  ;;  %v3649_v2 = vld [vmem:[%s3618_s23 + $0x18] sm:$0xff]  ;;  %v3654_v3 = vld [vmem:[%s3618_s23 + $0x10] sm:$0xff] }
 0x126   : > { %2573 = vmatprep.subr.bf16.mxu1 %v2572_v7  ;;  %v3664_v5 = vld [vmem:[%s3618_s23 + $0x20] sm:$0xff]  ;;  %v3667_v7 = vld [vmem:[%s3618_s23 + $0x38] sm:$0xff]  ;;  %v938_v10 = vld [vmem:[#allocation13 + $0x18] sm:$0xff] }
 0x127   : > { %v936_v9 = vld [vmem:[#allocation13 + $0x8] sm:$0xff]  ;;  %v935_v11 = vld [vmem:[#allocation13] sm:$0xff]  ;;  %v942_v15 = vld [vmem:[#allocation13 + $0x38] sm:$0xff] }
 0x128   : > { %2507 = vmatpush1.bf16.msra.mxu0 %v2506_v13  ;;  %v2592_v12 = vpack.c.bf16 %v938_v10, %v936_v9  ;;  %v937_v13 = vld [vmem:[#allocation13 + $0x10] sm:$0xff]  ;;  %v939_v18 = vld [vmem:[#allocation13 + $0x20] sm:$0xff]  ;;  %v944_v20 = vld [vmem:[#allocation13 + $0x48] sm:$0xff] }
 0x129   : > { %2575 = vmatpush1.bf16.msra.mxu1 %v2574_v14  ;;  %2509 = vmatprep.subr.bf16.mxu0 %v2508_v16  ;;  %v940_v14 = vld [vmem:[#allocation13 + $0x28] sm:$0xff]  ;;  %v2594_v16 = vpack.c.bf16 %v937_v13, %v935_v11  ;;  %v946_v21 = vld [vmem:[#allocation13 + $0x58] sm:$0xff]  ;;  %v943_v24 = vld [vmem:[#allocation13 + $0x40] sm:$0xff] }
 0x12a   : > { %2577 = vmatprep.subr.bf16.mxu1 %v2576_v19  ;;  %v2596_v17 = vpack.c.bf16 %v942_v15, %v940_v14  ;;  %v941_v19 = vld [vmem:[#allocation13 + $0x30] sm:$0xff]  ;;  %v2600_v23 = vpack.c.bf16 %v946_v21, %v944_v20  ;;  %v947_v29 = vld [vmem:[#allocation13 + $0x60] sm:$0xff]  ;;  %v954_v32 = vld [vmem:[#allocation13 + $0x98] sm:$0xff] }
 0x12b   : > { %v2598_v22 = vpack.c.bf16 %v941_v19, %v939_v18  ;;  %v949_v30 = vld [vmem:[#allocation13 + $0x70] sm:$0xff]  ;;  %v951_v35 = vld [vmem:[#allocation13 + $0x80] sm:$0xff]  ;;  %v962_v44 = vld [vmem:[#allocation13 + $0xd8] sm:$0xff] }
 0x12c   : > { %2511 = vmatpush1.bf16.msra.mxu0 %v2510_v25  ;;  %v948_v25 = vld [vmem:[#allocation13 + $0x68] sm:$0xff]  ;;  %v2606_v33 = vpack.c.bf16 %v949_v30, %v947_v29  ;;  %v953_v36 = vld [vmem:[#allocation13 + $0x90] sm:$0xff]  ;;  %v955_v41 = vld [vmem:[#allocation13 + $0xa0] sm:$0xff] }
 0x12d   : > { %2579 = vmatpush1.bf16.msra.mxu1 %v2578_v26  ;;  %2513 = vmatprep.subr.bf16.mxu0 %v2512_v28  ;;  %v950_v26 = vld [vmem:[#allocation13 + $0x78] sm:$0xff]  ;;  %v2610_v39 = vpack.c.bf16 %v953_v36, %v951_v35  ;;  %v957_v42 = vld [vmem:[#allocation13 + $0xb0] sm:$0xff]  ;;  %v959_v47 = vld [vmem:[#allocation13 + $0xc0] sm:$0xff] }
 0x12e   : > { %2581 = vmatprep.subr.bf16.mxu1 %v2580_v31  ;;  %v2604_v28 = vpack.c.bf16 %v950_v26, %v948_v25  ;;  %v952_v31 = vld [vmem:[#allocation13 + $0x88] sm:$0xff]  ;;  %v2614_v45 = vpack.c.bf16 %v957_v42, %v955_v41  ;;  %v961_v48 = vld [vmem:[#allocation13 + $0xd0] sm:$0xff]  ;;  %v963_v53 = vld [vmem:[#allocation13 + $0xe0] sm:$0xff] }
 0x12f   : > { %v2608_v34 = vpack.c.bf16 %v954_v32, %v952_v31  ;;  %v2618_v51 = vpack.c.bf16 %v961_v48, %v959_v47  ;;  %v965_v54 = vld [vmem:[#allocation13 + $0xf0] sm:$0xff]  ;;  %v970_v56 = vld [vmem:[#allocation13 + $0x118] sm:$0xff]  ;;  %v971_v9 = vld [vmem:[#allocation13 + $0x120] sm:$0xff]  ;;  %v671_v47 = vlaneseq }
 0x130   : > { %2515 = vmatpush1.bf16.msra.mxu0 %v2514_v37  ;;  %v956_v37 = vld [vmem:[#allocation13 + $0xa8] sm:$0xff]  ;;  %v2622_v57 = vpack.c.bf16 %v965_v54, %v963_v53  ;;  %v974_v62 = vld [vmem:[#allocation13 + $0x138] sm:$0xff]  ;;  %v973_v10 = vld [vmem:[#allocation13 + $0x130] sm:$0xff] }
 0x131   : > { %2583 = vmatpush1.bf16.msra.mxu1 %v2582_v38  ;;  %2517 = vmatprep.subr.bf16.mxu0 %v2516_v40  ;;  %v958_v38 = vld [vmem:[#allocation13 + $0xb8] sm:$0xff]  ;;  %v976_v11 = vld [vmem:[#allocation13 + $0x148] sm:$0xff]  ;;  %v2630_v13 = vpack.c.bf16 %v973_v10, %v971_v9  ;;  %v975_v15 = vld [vmem:[#allocation13 + $0x140] sm:$0xff]  ;;  %v672_v48 = vshrl.u32 %v671_v47, 7 }
 0x132   : > { %2585 = vmatprep.subr.bf16.mxu1 %v2584_v43  ;;  %v2612_v40 = vpack.c.bf16 %v958_v38, %v956_v37  ;;  %v960_v43 = vld [vmem:[#allocation13 + $0xc8] sm:$0xff]  ;;  %v982_v18 = vld [vmem:[#allocation13 + $0x178] sm:$0xff]  ;;  %v979_v21 = vld [vmem:[#allocation13 + $0x160] sm:$0xff] }
 0x133   : > { %v2616_v46 = vpack.c.bf16 %v962_v44, %v960_v43  ;;  %v983_v26 = vld [vmem:[#allocation13 + $0x180] sm:$0xff]  ;;  %v990_v29 = vld [vmem:[#allocation13 + $0x1b8] sm:$0xff]  ;;  %v3699_v53 = vsub.s32 1, %v672_v48 }
 0x134   : > { %2519 = vmatpush1.bf16.msra.mxu0 %v2518_v49  ;;  %v964_v49 = vld [vmem:[#allocation13 + $0xe8] sm:$0xff]  ;;  %v987_v32 = vld [vmem:[#allocation13 + $0x1a0] sm:$0xff]  ;;  %v994_v35 = vld [vmem:[#allocation13 + $0x1d8] sm:$0xff] }
 0x135   : > { %2587 = vmatpush1.bf16.msra.mxu1 %v2586_v50  ;;  %2521 = vmatprep.subr.bf16.mxu0 %v2520_v52  ;;  %v966_v50 = vld [vmem:[#allocation13 + $0xf8] sm:$0xff]  ;;  %v991_v38 = vld [vmem:[#allocation13 + $0x1c0] sm:$0xff] }
 0x136   : > { %2589 = vmatprep.subr.bf16.mxu1 %v2588_v55  ;;  %v2620_v52 = vpack.c.bf16 %v966_v50, %v964_v49  ;;  %v968_v55 = vld [vmem:[#allocation13 + $0x108] sm:$0xff]  ;;  %v998_v41 = vld [vmem:[#allocation13 + $0x1f8] sm:$0xff]  ;;  %v995_v44 = vld [vmem:[#allocation13 + $0x1e0] sm:$0xff]  ;;  %v3688_v49 = vsub.s32 0, %v672_v48 }
 0x137   : > { %v2624_v58 = vpack.c.bf16 %v970_v56, %v968_v55 }
 0x138   : > { %2523 = vmatpush1.bf16.msra.mxu0 %v2522_v59  ;;  %v967_v59 = vld [vmem:[#allocation13 + $0x100] sm:$0xff] }
 0x139   : > { %2591 = vmatpush1.bf16.msra.mxu1 %v2590_v60  ;;  %2525 = vmatprep.subr.bf16.mxu0 %v2524_v61  ;;  %v969_v60 = vld [vmem:[#allocation13 + $0x110] sm:$0xff]  ;;  %v972_v61 = vld [vmem:[#allocation13 + $0x128] sm:$0xff] }
 0x13a   : > { %v2626_v63 = vpack.c.bf16 %v969_v60, %v967_v59 }
 0x13c   : > { %911 = vmatmul.mubr.f32.vlgmr.msra.gmra.mrb[0].mxu1 %v3646_v1  ;;  %2527 = vmatpush1.bf16.msra.mxu0 %v2526_v0  ;;  %v2628_v0 = vpack.c.bf16 %v974_v62, %v972_v61 }
 0x13d   : > { %916 = vmatprep.mubr.f32.mxu1 %v3649_v2  ;;  %2593 = vmatprep.subr.bf16.mxu0 %v2592_v12  ;;  %v978_v12 = vld [vmem:[#allocation13 + $0x158] sm:$0xff] }
 0x13e   : > { %v2632_v14 = vpack.c.bf16 %v978_v12, %v976_v11 }
 0x13f   : > { %746 = vmatmul.mubr.f32.vlgmr.msra.gmra.mrb[0].mxu0 %v3646_v1 }
 0x140   : > { %917 = vmatmul.mubr.f32.gmra.mrb[2].mxu1 %v3654_v3  ;;  %751 = vmatprep.mubr.f32.mxu0 %v3649_v2 }
 0x141   : > { %922 = vmatprep.mubr.f32.mxu1 %v3657_v4  ;;  %2595 = vmatpush1.bf16.msra.mxu0 %v2594_v16  ;;  %v977_v16 = vld [vmem:[#allocation13 + $0x150] sm:$0xff] }
 0x142   : > { %2597 = vmatprep.subr.bf16.mxu0 %v2596_v17  ;;  %v980_v17 = vld [vmem:[#allocation13 + $0x168] sm:$0xff]  ;;  %v2634_v19 = vpack.c.bf16 %v977_v16, %v975_v15 }
 0x143   : > { %752 = vmatmul.mubr.f32.gmra.mrb[2].mxu0 %v3654_v3  ;;  %v2636_v20 = vpack.c.bf16 %v982_v18, %v980_v17 }
 0x144   : > { %923 = vmatmul.mubr.f32.gmra.mrb[4].mxu1 %v3664_v5  ;;  %757 = vmatprep.mubr.f32.mxu0 %v3657_v4 }
 0x145   : > { %928 = vmatprep.mubr.f32.mxu1 %v3667_v7  ;;  %2599 = vmatpush1.bf16.msra.mxu0 %v2598_v22  ;;  %v981_v22 = vld [vmem:[#allocation13 + $0x170] sm:$0xff] }
 0x146   : > { %2601 = vmatprep.subr.bf16.mxu0 %v2600_v23  ;;  %v984_v23 = vld [vmem:[#allocation13 + $0x188] sm:$0xff] }
 0x147   : > { %758 = vmatmul.mubr.f32.gmra.mrb[4].mxu0 %v3664_v5 }
 0x148   : > { %929 = vmatmul.mubr.f32.gmra.mrb[6].mxu1 %v3674_v8  ;;  %763 = vmatprep.mubr.f32.mxu0 %v3667_v7 }
 0x14b   : > { %764 = vmatmul.mubr.f32.gmra.mrb[6].mxu0 %v3674_v8 }
 0x14c   : > { %1075 = vmatprep.mubr.f32.mxu0 %v3641_v6  ;;  %v945_v6 = vld [vmem:[#allocation13 + $0x50] sm:$0xff] }
 0x14d   : > { %v2602_v27 = vpack.c.bf16 %v945_v6, %v943_v24  ;;  %v986_v24 = vld [vmem:[#allocation13 + $0x198] sm:$0xff]  ;;  %v2638_v6 = vpack.c.bf16 %v981_v22, %v979_v21 }
 0x14e   : > { %v2640_v25 = vpack.c.bf16 %v986_v24, %v984_v23 }
 0x14f   : > { %2603 = vmatpush1.bf16.msra.mxu0 %v2602_v27  ;;  %v985_v27 = vld [vmem:[#allocation13 + $0x190] sm:$0xff] }
 0x150   : > { %2605 = vmatprep.subr.bf16.mxu0 %v2604_v28  ;;  %v988_v28 = vld [vmem:[#allocation13 + $0x1a8] sm:$0xff]  ;;  %v2642_v30 = vpack.c.bf16 %v985_v27, %v983_v26  ;;  %v3741_v27 = vld [vmem:[#allocation7] sm:$0xff] }
 0x151   : > { %v2644_v31 = vpack.c.bf16 %v990_v29, %v988_v28  ;;  %v3743_v28 = vld [vmem:[#allocation7 + $0x8] sm:$0xff]  ;;  %v3745_v29 = vld [vmem:[#allocation8 + $0x8] sm:$0xff] }
 0x153   : > { %2607 = vmatpush1.bf16.msra.mxu0 %v2606_v33  ;;  %v989_v33 = vld [vmem:[#allocation13 + $0x1b0] sm:$0xff] }
 0x154   : > { %2609 = vmatprep.subr.bf16.mxu0 %v2608_v34  ;;  %v992_v34 = vld [vmem:[#allocation13 + $0x1c8] sm:$0xff]  ;;  %v2646_v36 = vpack.c.bf16 %v989_v33, %v987_v32 }
 0x155   : > { %v2648_v37 = vpack.c.bf16 %v994_v35, %v992_v34 }
 0x157   : > { %2611 = vmatpush1.bf16.msra.mxu0 %v2610_v39  ;;  %v993_v39 = vld [vmem:[#allocation13 + $0x1d0] sm:$0xff] }
 0x158   : > { %2613 = vmatprep.subr.bf16.mxu0 %v2612_v40  ;;  %v996_v40 = vld [vmem:[#allocation13 + $0x1e8] sm:$0xff]  ;;  %v2650_v42 = vpack.c.bf16 %v993_v39, %v991_v38 }
 0x159   : > { %v2652_v43 = vpack.c.bf16 %v998_v41, %v996_v40 }
 0x15b   : > { %2615 = vmatpush1.bf16.msra.mxu0 %v2614_v45  ;;  %v997_v45 = vld [vmem:[#allocation13 + $0x1f0] sm:$0xff] }
 0x15c   : > { %2617 = vmatprep.subr.bf16.mxu0 %v2616_v46  ;;  %v2654_v46 = vpack.c.bf16 %v997_v45, %v995_v44 }
 0x15f   : > { %2619 = vmatpush1.bf16.msra.mxu0 %v2618_v51 }
 0x160   : > { %2621 = vmatprep.subr.bf16.mxu0 %v2620_v52 }
 0x163   : > { %2623 = vmatpush1.bf16.msra.mxu0 %v2622_v57 }
 0x164   : > { %2625 = vmatprep.subr.bf16.mxu0 %v2624_v58 }
 0x167   : > { %2627 = vmatpush1.bf16.msra.mxu0 %v2626_v63 }
 0x168   : > { %2629 = vmatprep.subr.bf16.mxu0 %v2628_v0 }
 0x16b   : > { %2631 = vmatpush1.bf16.msra.mxu0 %v2630_v13 }
 0x16c   : > { %2633 = vmatprep.subr.bf16.mxu0 %v2632_v14 }
 0x16f   : > { %2635 = vmatpush1.bf16.msra.mxu0 %v2634_v19 }
 0x170   : > { %2637 = vmatprep.subr.bf16.mxu0 %v2636_v20 }
 0x173   : > { %2639 = vmatpush1.bf16.msra.mxu0 %v2638_v6 }
 0x174   : > { %2641 = vmatprep.subr.bf16.mxu0 %v2640_v25  ;;  %v3739_v25 = vld [vmem:[#allocation8] sm:$0xff] }
 0x177   : > { %2643 = vmatpush1.bf16.msra.mxu0 %v2642_v30 }
 0x178   : > { %2645 = vmatprep.subr.bf16.mxu0 %v2644_v31 }
 0x17b   : > { %2647 = vmatpush1.bf16.msra.mxu0 %v2646_v36 }
 0x17c   : > { %2649 = vmatprep.subr.bf16.mxu0 %v2648_v37 }
 0x17f   : > { %2651 = vmatpush1.bf16.msra.mxu0 %v2650_v42 }
 0x180   : > { %2653 = vmatprep.subr.bf16.mxu0 %v2652_v43 }
 0x183   : > { %2655 = vmatpush1.bf16.msra.mxu0 %v2654_v46 }
 0x186   : > { %1076 = vmatmul.mubr.f32.vlgmr.msra.gmra.mrb[8].mxu0 %v3646_v1  ;;  %v834_v1 = vld [vmem:[%s3909_s7] sm:$0x3] }
 0x187   : > { %1081 = vmatprep.mubr.f32.mxu0 %v3649_v2  ;;  %v839_v2 = vrot.slane %v834_v1, %v3688_v49  ;;  %v843_v60 = vrot.slane %v834_v1, %v3699_v53 }
 0x18a   : > { %1082 = vmatmul.mubr.f32.gmra.mrb[10].mxu0 %v3654_v3  ;;  %v669_v3 = vld [vmem:[%s3952_s18] sm:$0x3]  ;;  %s3956_s18 = sld [smem:[#allocation29_spill]] }
 0x18b   : > { %1087 = vmatprep.mubr.f32.mxu0 %v3657_v4  ;;  %v678_v19 = vrot.slane %v669_v3, %v3699_v53 }
 0x18e   : > { %1088 = vmatmul.mubr.f32.gmra.mrb[12].mxu0 %v3664_v5 }
 0x18f   : > { %1093 = vmatprep.mubr.f32.mxu0 %v3667_v7  ;;  %v674_v7 = vrot.slane %v669_v3, %v3688_v49 }
 0x192   : > { %1094 = vmatmul.mubr.f32.gmra.mrb[14].mxu0 %v3674_v8 }
 0x20f   : > { %v912_v50 = vpop.f32.mrb[0].mxu1 }
 0x210   : > { %v913_v4 = vadd.f32 %v912_v50, %v839_v2  ;;  %v914_v5 = vpop.f32.mrb[1].mxu1 }
 0x211   : > { %v3705_v10 = vadd.f32 %v914_v5, %v843_v60 }
 0x212   : > { %1108 = vrot.lane.b32.xlu0 %v913_v4, %s3246_s25  ;;  %v747_v8 = vpop.f32.mrb[0].mxu0  ;;  %v1128_v32 = vmul.f32 %v913_v4, %v3741_v27 }
 0x213   : > { %v918_v51 = vpop.f32.mrb[2].mxu1  ;;  %v749_v52 = vpop.f32.mrb[1].mxu0  ;;  %v748_v56 = vadd.f32 %v747_v8, %v674_v7 }
 0x214   : > { %v919_v54 = vadd.f32 %v918_v51, %v839_v2  ;;  %v920_v55 = vpop.f32.mrb[3].mxu1  ;;  %v750_v21 = vadd.f32 %v749_v52, %v678_v19 }
 0x215   : > { %v921_v17 = vadd.f32 %v920_v55, %v843_v60  ;;  %v1116_v39 = vmul.f32 %v748_v56, %v3741_v27 }
 0x216   : > { %1110 = vrot.lane.b32.xlu0 %v919_v54, %s3246_s25  ;;  %v753_v57 = vpop.f32.mrb[2].mxu0  ;;  %v1129_v33 = vmul.f32 %v919_v54, %v3743_v28 }
 0x217   : > { %v924_v58 = vpop.f32.mrb[4].mxu1  ;;  %v755_v59 = vpop.f32.mrb[3].mxu0  ;;  %v754_v13 = vadd.f32 %v753_v57, %v674_v7 }
 0x218   : > { %v925_v61 = vadd.f32 %v924_v58, %v839_v2  ;;  %v926_v62 = vpop.f32.mrb[5].mxu1  ;;  %v3731_v24 = vadd.f32 %v755_v59, %v678_v19  ;;  %v1525_v58 = vmul.f32 %v3705_v10, %v3741_v27  ;;  %v1526_v59 = vmul.f32 %v921_v17, %v3743_v28 }
 0x219   : > { %v3712_v18 = vadd.f32 %v926_v62, %v843_v60  ;;  %v1117_v50 = vmul.f32 %v754_v13, %v3743_v28 }
 0x21a   : > { %1112 = vrot.lane.b32.xlu1 %v925_v61, %s3246_s25  ;;  %1100 = vrot.lane.b32.xlu0 %v748_v56, %s3246_s25  ;;  %v759_v63 = vpop.f32.mrb[4].mxu0  ;;  %v1130_v46 = vmul.f32 %v925_v61, %v3741_v27 }
 0x21b   : > { %v930_v0 = vpop.f32.mrb[6].mxu1  ;;  %v761_v9 = vpop.f32.mrb[5].mxu0  ;;  %v760_v14 = vadd.f32 %v759_v63, %v674_v7  ;;  %v1513_v63 = vmul.f32 %v750_v21, %v3741_v27 }
 0x21c   : > { %v931_v11 = vadd.f32 %v930_v0, %v839_v2  ;;  %v932_v12 = vpop.f32.mrb[7].mxu1  ;;  %v3725_v23 = vadd.f32 %v761_v9, %v678_v19 }
 0x21d   : > { %v3723_v22 = vadd.f32 %v932_v12, %v843_v60  ;;  %v1118_v5 = vmul.f32 %v760_v14, %v3741_v27 }
 0x21e   : > { %1114 = vrot.lane.b32.xlu1 %v931_v11, %s3246_s25  ;;  %1505 = vrot.lane.b32.xlu0 %v3705_v10, %s3246_s25  ;;  %v765_v15 = vpop.f32.mrb[6].mxu0  ;;  %v1131_v47 = vmul.f32 %v931_v11, %v3743_v28 }
 0x21f   : > { %v767_v16 = vpop.f32.mrb[7].mxu0  ;;  %v3718_v20 = vadd.f32 %v765_v15, %v674_v7 }
 0x220   : > { %v3735_v6 = vadd.f32 %v767_v16, %v678_v19  ;;  %v1527_v19 = vmul.f32 %v3712_v18, %v3741_v27 }
 0x221   : > { %v1119_v11 = vmul.f32 %v3718_v20, %v3743_v28 }
 0x222   : > { %1102 = vrot.lane.b32.xlu1 %v754_v13, %s3246_s25  ;;  %1104 = vrot.lane.b32.xlu0 %v760_v14, %s3246_s25 }
 0x226   : > { %1507 = vrot.lane.b32.xlu1 %v921_v17, %s3246_s25  ;;  %1509 = vrot.lane.b32.xlu0 %v3712_v18, %s3246_s25 }
 0x22a   : > { %1106 = vrot.lane.b32.xlu1 %v3718_v20, %s3246_s25  ;;  %1497 = vrot.lane.b32.xlu0 %v750_v21, %s3246_s25  ;;  %v1528_v21 = vmul.f32 %v3723_v22, %v3743_v28 }
 0x22e   : > { %1511 = vrot.lane.b32.xlu1 %v3723_v22, %s3246_s25  ;;  %1501 = vrot.lane.b32.xlu0 %v3725_v23, %s3246_s25  ;;  %v1515_v22 = vmul.f32 %v3725_v23, %v3741_v27 }
 0x232   : > { %1499 = vrot.lane.b32.xlu1 %v3731_v24, %s3246_s25 }
 0x236   : > { %1503 = vrot.lane.b32.xlu1 %v3735_v6, %s3246_s25  ;;  %s588_s25 = scalar_lea.vmem [#allocation16], %s2349_s24  ;;  %s2375_s24 = sshll.u32 %s3346_s19, 10 }
 0x237   : > { %s2194_s17 = sshll.u32 %s588_s25, 4  ;;  %s3856_s14 = scalar_lea.hbm %s3957_s28, %s2375_s24  ;;  %s3858_s17 = int_to_ptr.vmem [resolvable:$true] %s2194_s17 }
 0x238   : > { %s2180_s19 = scalar_lea.sflag [#allocation4], %s3612_s27 }
 0x284   : > { %v1109_v26 = vpop.permute.xlu0 %1108 }
 0x285   : > { %v1132_v30 = vmul.f32 %v1109_v26, %v3739_v25 }
 0x287   : > { %v1136_v35 = vadd.f32 %v1132_v30, %v1128_v32 }
 0x288   : > { %v1111_v31 = vpop.permute.xlu0 %1110 }
 0x289   : > { %v1133_v34 = vmul.f32 %v1111_v31, %v3745_v29 }
 0x28b   : > { %v1137_v36 = vadd.f32 %v1133_v34, %v1129_v33  ;;  %v1514_v34 = vmul.f32 %v3731_v24, %v3743_v28  ;;  %v999_v24 = vld [vmem:[%s3953_s12] sm:$0x3] }
 0x28c   : > { %v1113_v37 = vpop.permute.xlu1 %1112  ;;  %v1101_v38 = vpop.permute.xlu0 %1100  ;;  %v1008_v23 = vrot.slane %v999_v24, %v3699_v53  ;;  %v1004_v27 = vrot.slane %v999_v24, %v3688_v49 }
 0x28d   : > { %v1120_v40 = vmul.f32 %v1101_v38, %v3739_v25  ;;  %v2656_v41 = vpack.c.bf16 %v1137_v36, %v1136_v35  ;;  %v1134_v42 = vmul.f32 %v1113_v37, %v3739_v25 }
 0x28f   : > { %v1124_v43 = vadd.f32 %v1120_v40, %v1116_v39  ;;  %2657 = vmatprep.subr.bf16.mxu0 %v2656_v41  ;;  %v1138_v1 = vadd.f32 %v1134_v42, %v1130_v46 }
 0x290   : > { %v1115_v44 = vpop.permute.xlu1 %1114  ;;  %2659 = vmatpush3.bf16.xpose.msra.mxu0 %v2656_v41  ;;  %v1506_v45 = vpop.permute.xlu0 %1505 }
 0x291   : > { %v1135_v48 = vmul.f32 %v1115_v44, %v3745_v29  ;;  %2412 = vmatprep.mubr.f32.mxu0 %v1124_v43  ;;  %v1529_v52 = vmul.f32 %v1506_v45, %v3739_v25  ;;  %v1077_v41 = vpop.f32.mrb[8].mxu0 }
 0x292   : > { %v1079_v42 = vpop.f32.mrb[9].mxu0  ;;  %v1078_v44 = vadd.f32 %v1077_v41, %v1004_v27 }
 0x293   : > { %v1139_v2 = vadd.f32 %v1135_v48, %v1131_v47  ;;  %v1533_v61 = vadd.f32 %v1529_v52, %v1525_v58  ;;  %v1080_v43 = vadd.f32 %v1079_v42, %v1008_v23  ;;  %v1083_v45 = vpop.f32.mrb[10].mxu0  ;;  %v600_v52 = vld [vmem:[#allocation5 + $0x8] sm:$0xff] }
 0x294   : > { %v1103_v3 = vpop.permute.xlu1 %1102  ;;  %v1105_v4 = vpop.permute.xlu0 %1104  ;;  %v1084_v46 = vadd.f32 %v1083_v45, %v1004_v27 }
 0x295   : > { %v1121_v7 = vmul.f32 %v1103_v3, %v3745_v29  ;;  %v1122_v8 = vmul.f32 %v1105_v4, %v3739_v25  ;;  %v2660_v51 = vpack.c.bf16 %v1139_v2, %v1138_v1 }
 0x296   : > { %v2664_v48 = vpack.c.bf16 %v1084_v46, %v1078_v44 }
 0x297   : > { %v1125_v54 = vadd.f32 %v1121_v7, %v1117_v50  ;;  %v1126_v55 = vadd.f32 %v1122_v8, %v1118_v5  ;;  %2661 = vmatprep.subr.bf16.mxu0 %v2660_v51 }
 0x298   : > { %v1508_v56 = vpop.permute.xlu1 %1507  ;;  %v1510_v57 = vpop.permute.xlu0 %1509  ;;  %2665 = vmatprep.subr.bf16.mxu1 %v2664_v48 }
 0x299   : > { %v1530_v60 = vmul.f32 %v1508_v56, %v3745_v29  ;;  %2413 = vmatmul.mubr.f32.vlgmr.msra.gmra.mrb[16].mxu0 %v1125_v54  ;;  %v1531_v14 = vmul.f32 %v1510_v57, %v3739_v25  ;;  %2667 = vmatpush3.bf16.msra.mxu1 %v2664_v48  ;;  %v599_v54 = vld [vmem:[#allocation5] sm:$0xff] }
 0x29a   : > { %2663 = vmatpush3.bf16.xpose.msra.mxu0 %v2660_v51  ;;  %2419 = vmatprep.mubr.f32.mxu0 %v1126_v55 }
 0x29b   : > { %v1534_v62 = vadd.f32 %v1530_v60, %v1526_v59  ;;  %v1535_v30 = vadd.f32 %v1531_v14, %v1527_v19 }
 0x29c   : > { %v1107_v0 = vpop.permute.xlu1 %1106  ;;  %v1498_v9 = vpop.permute.xlu0 %1497 }
 0x29d   : > { %v1123_v12 = vmul.f32 %v1107_v0, %v3745_v29  ;;  %v1517_v10 = vmul.f32 %v1498_v9, %v3739_v25  ;;  %v2672_v13 = vpack.c.bf16 %v1534_v62, %v1533_v61 }
 0x29f   : > { %v1127_v15 = vadd.f32 %v1123_v12, %v1119_v11  ;;  %v1521_v16 = vadd.f32 %v1517_v10, %v1513_v63  ;;  %2673 = vmatprep.subr.bf16.mxu0 %v2672_v13 }
 0x2a0   : > { %v1512_v17 = vpop.permute.xlu1 %1511  ;;  %v1502_v20 = vpop.permute.xlu0 %1501 }
 0x2a1   : > { %v1532_v26 = vmul.f32 %v1512_v17, %v3745_v29  ;;  %2420 = vmatmul.mubr.f32.vlgmr.msra.gmra.mrb[18].mxu0 %v1127_v15  ;;  %v1519_v32 = vmul.f32 %v1502_v20, %v3739_v25  ;;  %v1516_v25 = vmul.f32 %v3735_v6, %v3743_v28 }
 0x2a2   : > { %2675 = vmatpush3.bf16.xpose.msra.mxu0 %v2672_v13  ;;  %2440 = vmatprep.mubr.f32.mxu0 %v1521_v16 }
 0x2a3   : > { %v1536_v31 = vadd.f32 %v1532_v26, %v1528_v21  ;;  %v1523_v37 = vadd.f32 %v1519_v32, %v1515_v22 }
 0x2a4   : > { %v1500_v33 = vpop.permute.xlu1 %1499 }
 0x2a5   : > { %v1518_v35 = vmul.f32 %v1500_v33, %v3745_v29  ;;  %v2676_v18 = vpack.c.bf16 %v1536_v31, %v1535_v30 }
 0x2a7   : > { %v1522_v36 = vadd.f32 %v1518_v35, %v1514_v34  ;;  %2677 = vmatprep.subr.bf16.mxu0 %v2676_v18 }
 0x2a8   : > { %v1504_v38 = vpop.permute.xlu1 %1503 }
 0x2a9   : > { %2441 = vmatmul.mubr.f32.vlgmr.msra.gmra.mrb[20].mxu0 %v1522_v36  ;;  %v1520_v39 = vmul.f32 %v1504_v38, %v3745_v29  ;;  %v1085_v29 = vpop.f32.mrb[11].mxu0 }
 0x2aa   : > { %2679 = vmatpush3.bf16.xpose.msra.mxu0 %v2676_v18  ;;  %2447 = vmatprep.mubr.f32.mxu0 %v1523_v37  ;;  %v1086_v47 = vadd.f32 %v1085_v29, %v1008_v23  ;;  %v1089_v28 = vpop.f32.mrb[12].mxu0 }
 0x2ab   : > { %v1524_v40 = vadd.f32 %v1520_v39, %v1516_v25  ;;  %v1091_v1 = vpop.f32.mrb[13].mxu0  ;;  %v1090_v50 = vadd.f32 %v1089_v28, %v1004_v27 }
 0x2ac   : > { %v3791_v6 = vpack.c.bf16 %v1086_v47, %v1080_v43  ;;  %v1092_v2 = vadd.f32 %v1091_v1, %v1008_v23  ;;  %v1095_v3 = vpop.f32.mrb[14].mxu0 }
 0x2ad   : > { %v1096_v4 = vadd.f32 %v1095_v3, %v1004_v27  ;;  %v1097_v5 = vpop.f32.mrb[15].mxu0 }
 0x2ae   : > { %v1098_v7 = vadd.f32 %v1097_v5, %v1008_v23 }
 0x2af   : > { %v3793_v8 = vpack.c.bf16 %v1096_v4, %v1090_v50 }
 0x2b0   : > { %v3795_v51 = vpack.c.bf16 %v1098_v7, %v1092_v2 }
 0x2b1   : > { %2448 = vmatmul.mubr.f32.vlgmr.msra.gmra.mrb[22].mxu0 %v1524_v40  ;;  %2669 = vmatprep.subr.bf16.mxu1 %v3793_v8 }
 0x36c   : > { %v2414_v55 = vpop.f32.mrb[16].mxu0 }
 0x36d   : > { %v1212_v56 = vadd.f32 %v2414_v55, %v600_v52  ;;  %v1206_v57 = vpop.f32.mrb[17].mxu0 }
 0x36e   : > { %v1207_v58 = vadd.f32 %v1206_v57, %v599_v54 }
 0x36f   : > { %v1294_v59 = vsel %vm1290_vm0, %v1212_v56, -inf }
 0x370   : > { %1295 = vmax.xlane.f32.xlu1 %v1294_v59  ;;  %v1291_v60 = vsel %vm1290_vm0, %v1207_v58, -inf }
 0x371   : > { %1292 = vmax.xlane.f32.xlu0 %v1291_v60 }
 0x374   : > { %v2421_v61 = vpop.f32.mrb[18].mxu0 }
 0x375   : > { %v1281_v62 = vpop.f32.mrb[19].mxu0  ;;  %v1287_v0 = vadd.f32 %v2421_v61, %v600_v52 }
 0x376   : > { %v1282_v63 = vadd.f32 %v1281_v62, %v599_v54 }
 0x377   : > { %v1300_v12 = vsel %vm1290_vm0, %v1287_v0, -inf }
 0x378   : > { %v1297_v9 = vsel %vm1290_vm0, %v1282_v63, -inf }
 0x379   : > { %1298 = vmax.xlane.f32.xlu0 %v1297_v9 }
 0x37c   : > { %v2442_v11 = vpop.f32.mrb[20].mxu0 }
 0x37d   : > { %v1609_v10 = vadd.f32 %v2442_v11, %v600_v52  ;;  %v1603_v13 = vpop.f32.mrb[21].mxu0  ;;  %1301 = vmax.xlane.f32.xlu0 %v1300_v12 }
 0x37e   : > { %v1604_v14 = vadd.f32 %v1603_v13, %v599_v54 }
 0x37f   : > { %v1690_v15 = vsel %vm1290_vm0, %v1609_v10, -inf }
 0x380   : > { %v1687_v16 = vsel %vm1290_vm0, %v1604_v14, -inf }
 0x381   : > { %1688 = vmax.xlane.f32.xlu1 %v1687_v16  ;;  %1691 = vmax.xlane.f32.xlu0 %v1690_v15 }
 0x384   : > { %v2449_v17 = vpop.f32.mrb[22].mxu0 }
 0x385   : > { %v1684_v19 = vadd.f32 %v2449_v17, %v600_v52  ;;  %v1678_v21 = vpop.f32.mrb[23].mxu0 }
 0x386   : > { %v1679_v26 = vadd.f32 %v1678_v21, %v599_v54 }
 0x387   : > { %v1696_v20 = vsel %vm1290_vm0, %v1684_v19, -inf }
 0x388   : > { %1697 = vmax.xlane.f32.xlu0 %v1696_v20  ;;  %v1693_v30 = vsel %vm1290_vm0, %v1679_v26, -inf }
 0x389   : > { %1694 = vmax.xlane.f32.xlu1 %v1693_v30 }
 0x3fd   : > { %v1296_v31 = vpop.xlane.xlu1 %1295 }
 0x3fe   : > { %v1304_v32 = vsub.f32 %v1212_v56, %v1296_v31  ;;  %v1293_v33 = vpop.xlane.xlu0 %1292 }
 0x3ff   : > { %v1303_v34 = vsub.f32 %v1207_v58, %v1293_v33 }
 0x400   : > { %v1309_v35 = vmul.f32 1.442695, %v1304_v32 }
 0x401   : > { %v1307_v18 = vmul.f32 1.442695, %v1303_v34  ;;  %v1893_v34 = vld [vmem:[#allocation14] sm:$0xff] }
 0x402   : > { %2876 = vpow2.f32 %v1309_v35  ;;  %v1895_v35 = vld [vmem:[#allocation14 + $0x10] sm:$0xff] }
 0x403   : > { %2878 = vpow2.f32 %v1307_v18 }
 0x406   : > { %v1299_v22 = vpop.xlane.xlu0 %1298 }
 0x407   : > { %v1305_v36 = vsub.f32 %v1282_v63, %v1299_v22  ;;  %v1898_v22 = vld [vmem:[#allocation14 + $0x28] sm:$0xff] }
 0x409   : > { %v1311_v37 = vmul.f32 1.442695, %v1305_v36  ;;  %v1900_v36 = vld [vmem:[#allocation14 + $0x38] sm:$0xff] }
 0x40a   : > { %v1302_v38 = vpop.xlane.xlu0 %1301 }
 0x40b   : > { %2880 = vpow2.f32 %v1311_v37  ;;  %v1306_v39 = vsub.f32 %v1287_v0, %v1302_v38  ;;  %v2690_v38 = vpack.c.bf16 %v1895_v35, %v1893_v34 }
 0x40c   : > { %v2877_v25 = vpop.eup %2876 }
 0x40d   : > { %v2879_v40 = vpop.eup %2878  ;;  %v1313_v24 = vmul.f32 1.442695, %v1306_v39  ;;  %v1318_v23 = vsel %vm1290_vm0, %v2877_v25, 0.0 }
 0x40e   : > { %v1689_v27 = vpop.xlane.xlu1 %1688  ;;  %1319 = vadd.xlane.f32.xlu0 %v1318_v23  ;;  %v1692_v41 = vpop.xlane.xlu0 %1691  ;;  %v1315_v42 = vsel %vm1290_vm0, %v2879_v40, 0.0  ;;  %v1902_v23 = vld [vmem:[#allocation14 + $0x48] sm:$0xff] }
 0x40f   : > { %2882 = vpow2.f32 %v1313_v24  ;;  %v1699_v43 = vsub.f32 %v1604_v14, %v1689_v27  ;;  %v1700_v44 = vsub.f32 %v1609_v10, %v1692_v41  ;;  %1316 = vadd.xlane.f32.xlu1 %v1315_v42  ;;  %v1899_v24 = vld [vmem:[#allocation14 + $0x30] sm:$0xff]  ;;  %v1904_v27 = vld [vmem:[#allocation14 + $0x58] sm:$0xff]  ;;  %v1901_v42 = vld [vmem:[#allocation14 + $0x40] sm:$0xff] }
 0x410   : > { %v2696_v41 = vpack.c.bf16 %v1904_v27, %v1902_v23  ;;  %v1944_v23 = vld [vmem:[#allocation14 + $0x198] sm:$0xff]  ;;  %v1941_v27 = vld [vmem:[#allocation14 + $0x180] sm:$0xff] }
 0x411   : > { %v1703_v45 = vmul.f32 1.442695, %v1699_v43  ;;  %v1705_v46 = vmul.f32 1.442695, %v1700_v44  ;;  %v1903_v43 = vld [vmem:[#allocation14 + $0x50] sm:$0xff]  ;;  %v1906_v44 = vld [vmem:[#allocation14 + $0x68] sm:$0xff] }
 0x413   : > { %2884 = vpow2.f32 %v1703_v45  ;;  %v1908_v45 = vld [vmem:[#allocation14 + $0x78] sm:$0xff] }
 0x414   : > { %2886 = vpow2.f32 %v1705_v46  ;;  %v2698_v46 = vpack.c.bf16 %v1903_v43, %v1901_v42  ;;  %v1946_v42 = vld [vmem:[#allocation14 + $0x1a8] sm:$0xff]  ;;  %v1948_v43 = vld [vmem:[#allocation14 + $0x1b8] sm:$0xff] }
 0x415   : > { %v2881_v29 = vpop.eup %2880  ;;  %v1698_v47 = vpop.xlane.xlu0 %1697 }
 0x416   : > { %v1702_v48 = vsub.f32 %v1684_v19, %v1698_v47  ;;  %v1695_v28 = vpop.xlane.xlu1 %1694  ;;  %v1321_v1 = vsel %vm1290_vm0, %v2881_v29, 0.0  ;;  %v1905_v47 = vld [vmem:[#allocation14 + $0x60] sm:$0xff] }
 0x417   : > { %v1701_v2 = vsub.f32 %v1679_v26, %v1695_v28  ;;  %1322 = vadd.xlane.f32.xlu1 %v1321_v1  ;;  %v1894_v26 = vld [vmem:[#allocation14 + $0x8] sm:$0xff]  ;;  %v1912_v1 = vld [vmem:[#allocation14 + $0x98] sm:$0xff] }
 0x418   : > { %v1709_v50 = vmul.f32 1.442695, %v1702_v48  ;;  %v1907_v48 = vld [vmem:[#allocation14 + $0x70] sm:$0xff]  ;;  %v1910_v28 = vld [vmem:[#allocation14 + $0x88] sm:$0xff] }
 0x419   : > { %v2883_v3 = vpop.eup %2882  ;;  %v1707_v4 = vmul.f32 1.442695, %v1701_v2  ;;  %v2702_v2 = vpack.c.bf16 %v1907_v48, %v1905_v47  ;;  %v1950_v48 = vld [vmem:[#allocation14 + $0x1c8] sm:$0xff] }
 0x41a   : > { %2888 = vpow2.f32 %v1709_v50  ;;  %v1324_v5 = vsel %vm1290_vm0, %v2883_v3, 0.0  ;;  %v2704_v50 = vpack.c.bf16 %v1912_v1, %v1910_v28  ;;  %v1952_v28 = vld [vmem:[#allocation14 + $0x1d8] sm:$0xff] }
 0x41b   : > { %2890 = vpow2.f32 %v1707_v4  ;;  %1325 = vadd.xlane.f32.xlu0 %v1324_v5  ;;  %v1911_v4 = vld [vmem:[#allocation14 + $0x90] sm:$0xff]  ;;  %v1914_v5 = vld [vmem:[#allocation14 + $0xa8] sm:$0xff]  ;;  %v2744_v1 = vpack.c.bf16 %v1952_v28, %v1950_v48 }
 0x41d   : > { %v2885_v7 = vpop.eup %2884 }
 0x41e   : > { %v2887_v52 = vpop.eup %2886  ;;  %v1711_v54 = vsel %vm1290_vm0, %v2885_v7, 0.0 }
 0x41f   : > { %1712 = vadd.xlane.f32.xlu1 %v1711_v54  ;;  %v1714_v55 = vsel %vm1290_vm0, %v2887_v52, 0.0 }
 0x420   : > { %1715 = vadd.xlane.f32.xlu0 %v1714_v55  ;;  %v1913_v55 = vld [vmem:[#allocation14 + $0xa0] sm:$0xff] }
 0x424   : > { %v2889_v56 = vpop.eup %2888 }
 0x425   : > { %v2891_v57 = vpop.eup %2890  ;;  %v1720_v58 = vsel %vm1290_vm0, %v2889_v56, 0.0 }
 0x426   : > { %1721 = vadd.xlane.f32.xlu0 %v1720_v58  ;;  %v1717_v59 = vsel %vm1290_vm0, %v2891_v57, 0.0  ;;  %v1920_v58 = vld [vmem:[#allocation14 + $0xd8] sm:$0xff] }
 0x427   : > { %1718 = vadd.xlane.f32.xlu1 %v1717_v59 }
 0x49b   : > { %v1320_v60 = vpop.xlane.xlu0 %1319 }
 0x49c   : > { %2892 = vrcp.f32 %v1320_v60  ;;  %v1317_v61 = vpop.xlane.xlu1 %1316 }
 0x49d   : > { %2894 = vrcp.f32 %v1317_v61  ;;  %v1917_v61 = vld [vmem:[#allocation14 + $0xc0] sm:$0xff] }
 0x4a4   : > { %v1323_v62 = vpop.xlane.xlu1 %1322 }
 0x4a5   : > { %2896 = vrcp.f32 %v1323_v62  ;;  %v1919_v62 = vld [vmem:[#allocation14 + $0xd0] sm:$0xff] }
 0x4a6   : > { %v2893_v63 = vpop.eup %2892 }
 0x4a7   : > { %v2895_v0 = vpop.eup %2894  ;;  %v1330_v12 = vmul.f32 %v2893_v63, %v2877_v25  ;;  %v2692_v25 = vpack.c.bf16 %v1900_v36, %v1898_v22  ;;  %v1922_v63 = vld [vmem:[#allocation14 + $0xe8] sm:$0xff]  ;;  %v1935_v22 = vld [vmem:[#allocation14 + $0x150] sm:$0xff] }
 0x4a8   : > { %v1326_v9 = vpop.xlane.xlu0 %1325  ;;  %v1328_v11 = vmul.f32 %v2895_v0, %v2879_v40  ;;  %v1897_v40 = vld [vmem:[#allocation14 + $0x20] sm:$0xff]  ;;  %v1924_v0 = vld [vmem:[#allocation14 + $0xf8] sm:$0xff]  ;;  %v1938_v36 = vld [vmem:[#allocation14 + $0x168] sm:$0xff] }
 0x4a9   : > { %2898 = vrcp.f32 %v1326_v9  ;;  %v2714_v9 = vpack.c.bf16 %v1919_v62, %v1917_v61 }
 0x4aa   : > { %2426 = vmatprep.mubr.msk.f32.mxu1 %vm1290_vm0, %v1328_v11  ;;  %v2716_v11 = vpack.c.bf16 %v1924_v0, %v1922_v63  ;;  %v1957_v0 = vld [vmem:[%s3954_s1] sm:$0x3]  ;;  %s3150_s1 = scalar_lea.vmem %s3858_s17, 1024 }
 0x4ab   : > { %2427 = vmatmul.mubr.msk.f32.vlgmr.msra.gmra.mrb[8].mxu1 %vm1290_vm0, %v1330_v12  ;;  %v1921_v12 = vld [vmem:[#allocation14 + $0xe0] sm:$0xff]  ;;  %p3151_p10 = scmp.ne.s32.totalorder %s3858_s17, %s3150_s1 }
 0x4ac   : > { %2671 = vmatpush3.bf16.msra.mxu1 %v3793_v8  ;;  %v1713_v10 = vpop.xlane.xlu1 %1712  ;;  %v1896_v8 = vld [vmem:[#allocation14 + $0x18] sm:$0xff] }
 0x4ad   : > { %2900 = vrcp.f32 %v1713_v10  ;;  %2681 = vmatprep.subr.bf16.mxu1 %v3791_v6  ;;  %v1716_v13 = vpop.xlane.xlu0 %1715  ;;  %v2688_v33 = vpack.c.bf16 %v1896_v8, %v1894_v26  ;;  %v1923_v10 = vld [vmem:[#allocation14 + $0xf0] sm:$0xff]  ;;  %v1932_v26 = vld [vmem:[#allocation14 + $0x138] sm:$0xff]  ;;  %p3152_p11 = pnand %p3151_p10, %p3958_p1 }
 0x4ae   : > { %2902 = vrcp.f32 %v1716_v13  ;;  %v1926_v13 = vld [vmem:[#allocation14 + $0x108] sm:$0xff] }
 0x4af   : > { %v2897_v14 = vpop.eup %2896  ;;  %p3153_p12 = pneg %p3152_p11 }
 0x4b0   : > { %v1332_v15 = vmul.f32 %v2897_v14, %v2881_v29  ;;  %v2700_v29 = vpack.c.bf16 %v1908_v45, %v1906_v44  ;;  %v1928_v14 = vld [vmem:[#allocation14 + $0x118] sm:$0xff]  ;;  %v2740_v45 = vpack.c.bf16 %v1948_v43, %v1946_v42  ;;  %v2923_v43 = vld [vmem:[%s3618_s23 + $0x38] sm:$0xff] }
 0x4b2   : > { %2433 = vmatprep.mubr.msk.f32.mxu1 %vm1290_vm0, %v1332_v15  ;;  %v2718_v15 = vpack.c.bf16 %v1923_v10, %v1921_v12 }
 0x4b3   : > { %v2899_v16 = vpop.eup %2898  ;;  %v1722_v17 = vpop.xlane.xlu0 %1721 }
 0x4b4   : > { %v1334_v19 = vmul.f32 %v2899_v16, %v2883_v3  ;;  %2904 = vrcp.f32 %v1722_v17  ;;  %v1719_v21 = vpop.xlane.xlu1 %1718  ;;  %v1909_v3 = vld [vmem:[#allocation14 + $0x80] sm:$0xff]  ;;  %v2720_v16 = vpack.c.bf16 %v1928_v14, %v1926_v13 }
 0x4b5   : > { %2906 = vrcp.f32 %v1719_v21  ;;  %v1925_v17 = vld [vmem:[#allocation14 + $0x100] sm:$0xff]  ;;  %v1930_v21 = vld [vmem:[#allocation14 + $0x128] sm:$0xff] }
 0x4b6   : > { %2434 = vmatmul.mubr.msk.f32.vlgmr.msra.gmra.mrb[10].mxu1 %vm1290_vm0, %v1334_v19  ;;  %v1927_v19 = vld [vmem:[#allocation14 + $0x110] sm:$0xff] }
 0x4b7   : > { %v2901_v20 = vpop.eup %2900  ;;  %2683 = vmatpush3.bf16.msra.mxu1 %v3791_v6  ;;  %v2722_v8 = vpack.c.bf16 %v1927_v19, %v1925_v17  ;;  %v2917_v17 = vld [vmem:[%s3618_s23 + $0x8] sm:$0xff] }
 0x4b8   : > { %v2903_v30 = vpop.eup %2902  ;;  %2685 = vmatprep.subr.bf16.mxu1 %v3795_v51  ;;  %v1724_v31 = vmul.f32 %v2901_v20, %v2885_v7  ;;  %v1916_v7 = vld [vmem:[#allocation14 + $0xb8] sm:$0xff]  ;;  %v2724_v20 = vpack.c.bf16 %v1932_v26, %v1930_v21 }
 0x4b9   : > { %v1726_v32 = vmul.f32 %v2903_v30, %v2887_v52  ;;  %v2706_v52 = vpack.c.bf16 %v1911_v4, %v1909_v3  ;;  %v2708_v54 = vpack.c.bf16 %v1916_v7, %v1914_v5  ;;  %v1929_v30 = vld [vmem:[#allocation14 + $0x120] sm:$0xff]  ;;  %v1954_v4 = vld [vmem:[#allocation14 + $0x1e8] sm:$0xff]  ;;  %v1956_v5 = vld [vmem:[#allocation14 + $0x1f8] sm:$0xff] }
 0x4ba   : > { %2454 = vmatprep.mubr.msk.f32.mxu1 %vm1290_vm0, %v1724_v31  ;;  %v1931_v31 = vld [vmem:[#allocation14 + $0x130] sm:$0xff]  ;;  %v2748_v7 = vpack.c.bf16 %v1956_v5, %v1954_v4 }
 0x4bb   : > { %2455 = vmatmul.mubr.msk.f32.vlgmr.msra.gmra.mrb[12].mxu1 %vm1290_vm0, %v1726_v32  ;;  %v1934_v32 = vld [vmem:[#allocation14 + $0x148] sm:$0xff]  ;;  %v2726_v34 = vpack.c.bf16 %v1931_v31, %v1929_v30  ;;  %v2918_v31 = vld [vmem:[%s3618_s23 + $0x10] sm:$0xff] }
 0x4bc   : > { %2687 = vmatpush3.bf16.msra.mxu1 %v3795_v51  ;;  %v2694_v51 = vpack.c.bf16 %v1899_v24, %v1897_v40  ;;  %v1942_v24 = vld [vmem:[#allocation14 + $0x188] sm:$0xff] }
 0x4bd   : > { %2689 = vmatprep.subr.bf16.mxu1 %v2688_v33  ;;  %v1936_v33 = vld [vmem:[#allocation14 + $0x158] sm:$0xff] }
 0x4be   : > { %v2905_v18 = vpop.eup %2904  ;;  %v2728_v35 = vpack.c.bf16 %v1936_v33, %v1934_v32  ;;  %v2919_v33 = vld [vmem:[%s3618_s23 + $0x18] sm:$0xff] }
 0x4bf   : > { %v2907_v37 = vpop.eup %2906  ;;  %v1730_v39 = vmul.f32 %v2905_v18, %v2889_v56  ;;  %v1915_v56 = vld [vmem:[#allocation14 + $0xb0] sm:$0xff]  ;;  %v1933_v18 = vld [vmem:[#allocation14 + $0x140] sm:$0xff] }
 0x4c0   : > { %v1728_v6 = vmul.f32 %v2907_v37, %v2891_v57  ;;  %v1918_v57 = vld [vmem:[#allocation14 + $0xc8] sm:$0xff]  ;;  %v2710_v59 = vpack.c.bf16 %v1915_v56, %v1913_v55  ;;  %v1940_v37 = vld [vmem:[#allocation14 + $0x178] sm:$0xff] }
 0x4c1   : > { %v2712_v60 = vpack.c.bf16 %v1920_v58, %v1918_v57 }
 0x4c2   : > { %2461 = vmatprep.mubr.msk.f32.mxu1 %vm1290_vm0, %v1728_v6  ;;  %v2730_v6 = vpack.c.bf16 %v1935_v22, %v1933_v18 }
 0x4c3   : > { %2462 = vmatmul.mubr.msk.f32.vlgmr.msra.gmra.mrb[14].mxu1 %vm1290_vm0, %v1730_v39  ;;  %v1937_v39 = vld [vmem:[#allocation14 + $0x160] sm:$0xff] }
 0x4c4   : > { %2691 = vmatpush1.bf16.msra.mxu1 %v2690_v38  ;;  %v2732_v38 = vpack.c.bf16 %v1940_v37, %v1938_v36 }
 0x4c5   : > { %2693 = vmatprep.subr.bf16.mxu1 %v2692_v25  ;;  %v1939_v25 = vld [vmem:[#allocation14 + $0x170] sm:$0xff] }
 0x4c6   : > { %v2734_v40 = vpack.c.bf16 %v1939_v25, %v1937_v39  ;;  %v2921_v39 = vld [vmem:[%s3618_s23 + $0x28] sm:$0xff] }
 0x4c8   : > { %2695 = vmatpush1.bf16.msra.mxu1 %v2694_v51  ;;  %v2736_v51 = vpack.c.bf16 %v1944_v23, %v1942_v24 }
 0x4c9   : > { %2697 = vmatprep.subr.bf16.mxu1 %v2696_v41  ;;  %v1943_v41 = vld [vmem:[#allocation14 + $0x190] sm:$0xff] }
 0x4ca   : > { %v2738_v44 = vpack.c.bf16 %v1943_v41, %v1941_v27  ;;  %v2922_v41 = vld [vmem:[%s3618_s23 + $0x30] sm:$0xff] }
 0x4cc   : > { %2699 = vmatpush1.bf16.msra.mxu1 %v2698_v46  ;;  %v1945_v46 = vld [vmem:[#allocation14 + $0x1a0] sm:$0xff] }
 0x4cd   : > { %2701 = vmatprep.subr.bf16.mxu1 %v2700_v29  ;;  %v1947_v29 = vld [vmem:[#allocation14 + $0x1b0] sm:$0xff] }
 0x4ce   : > { %v2742_v47 = vpack.c.bf16 %v1947_v29, %v1945_v46 }
 0x4d0   : > { %2703 = vmatpush1.bf16.msra.mxu1 %v2702_v2  ;;  %v1949_v2 = vld [vmem:[#allocation14 + $0x1c0] sm:$0xff] }
 0x4d1   : > { %2705 = vmatprep.subr.bf16.mxu1 %v2704_v50  ;;  %v1951_v50 = vld [vmem:[#allocation14 + $0x1d0] sm:$0xff] }
 0x4d2   : > { %v2746_v3 = vpack.c.bf16 %v1951_v50, %v1949_v2 }
 0x4d4   : > { %2707 = vmatpush1.bf16.msra.mxu1 %v2706_v52  ;;  %v1953_v52 = vld [vmem:[#allocation14 + $0x1e0] sm:$0xff] }
 0x4d5   : > { %2709 = vmatprep.subr.bf16.mxu1 %v2708_v54  ;;  %v1955_v54 = vld [vmem:[#allocation14 + $0x1f0] sm:$0xff] }
 0x4d6   : > { %v2750_v55 = vpack.c.bf16 %v1955_v54, %v1953_v52 }
 0x4d8   : > { %2711 = vmatpush1.bf16.msra.mxu1 %v2710_v59 }
 0x4d9   : > { %2713 = vmatprep.subr.bf16.mxu1 %v2712_v60 }
 0x4dc   : > { %2715 = vmatpush1.bf16.msra.mxu1 %v2714_v9  ;;  %v1962_v9 = vrot.slane %v1957_v0, %v3688_v49 }
 0x4dd   : > { %2717 = vmatprep.subr.bf16.mxu1 %v2716_v11  ;;  %v1966_v11 = vrot.slane %v1957_v0, %v3699_v53 }
 0x4e0   : > { %2719 = vmatpush1.bf16.msra.mxu1 %v2718_v15  ;;  %v2916_v15 = vld [vmem:[%s3618_s23] sm:$0xff] }
 0x4e1   : > { %2721 = vmatprep.subr.bf16.mxu1 %v2720_v16 }
 0x4e4   : > { %2723 = vmatpush1.bf16.msra.mxu1 %v2722_v8 }
 0x4e5   : > { %2725 = vmatprep.subr.bf16.mxu1 %v2724_v20 }
 0x4e8   : > { %2727 = vmatpush1.bf16.msra.mxu1 %v2726_v34 }
 0x4e9   : > { %2729 = vmatprep.subr.bf16.mxu1 %v2728_v35 }
 0x4ec   : > { %2731 = vmatpush1.bf16.msra.mxu1 %v2730_v6  ;;  %v2920_v6 = vld [vmem:[%s3618_s23 + $0x20] sm:$0xff]  ;;  %s3247_s23 = smov [#allocation16]  }
 0x4ed   : > { %2733 = vmatprep.subr.bf16.mxu1 %v2732_v38  ;;  %s3154_s20 = sshll.u32 %s3247_s23, 4  ;;  %s3155_s20 = int_to_ptr.vmem [resolvable:$false] %s3154_s20 }
 0x4ee   : > { %p3157_p13 = scmp.lt.s32.totalorder %s3858_s17, %s3155_s20 }
 0x4f0   : > { %2735 = vmatpush1.bf16.msra.mxu1 %v2734_v40 }
 0x4f1   : > { %2737 = vmatprep.subr.bf16.mxu1 %v2736_v51 }
 0x4f4   : > { %2739 = vmatpush1.bf16.msra.mxu1 %v2738_v44 }
 0x4f5   : > { %2741 = vmatprep.subr.bf16.mxu1 %v2740_v45 }
 0x4f8   : > { %2743 = vmatpush1.bf16.msra.mxu1 %v2742_v47 }
 0x4f9   : > { %2745 = vmatprep.subr.bf16.mxu1 %v2744_v1 }
 0x4fc   : > { %2747 = vmatpush1.bf16.msra.mxu1 %v2746_v3 }
 0x4fd   : > { %2749 = vmatprep.subr.bf16.mxu1 %v2748_v7 }
 0x500   : > { %2751 = vmatpush1.bf16.msra.mxu1 %v2750_v55 }
 0x57e   : > { %v2428_v56 = vpop.f32.mrb[8].mxu1 }
 0x57f   : > { %v1407_v57 = vpop.f32.mrb[9].mxu1 }
 0x589   : > { %v2435_v58 = vpop.f32.mrb[10].mxu1 }
 0x58a   : > { %v1488_v59 = vpop.f32.mrb[11].mxu1 }
 0x58e   : > { %v2456_v60 = vpop.f32.mrb[12].mxu1 }
 0x58f   : > { %v1803_v61 = vpop.f32.mrb[13].mxu1 }
 0x590   : > { %2033 = vmatprep.mubr.f32.mxu1 %v1803_v61 }
 0x591   : > { %2034 = vmatmul.mubr.f32.vlgmr.msra.gmra.mrb[16].mxu1 %v1407_v57 }
 0x592   : > { %2039 = vmatprep.mubr.f32.mxu1 %v2456_v60 }
 0x595   : > { %2040 = vmatmul.mubr.f32.gmra.mrb[18].mxu1 %v2428_v56 }
 0x596   : > { %v2463_v62 = vpop.f32.mrb[14].mxu1 }
 0x597   : > { %v1884_v63 = vpop.f32.mrb[15].mxu1 }
 0x598   : > { %2045 = vmatprep.mubr.f32.mxu1 %v1884_v63 }
 0x599   : > { %2046 = vmatmul.mubr.f32.gmra.mrb[20].mxu1 %v1488_v59 }
 0x59a   : > { %2051 = vmatprep.mubr.f32.mxu1 %v2463_v62 }
 0x59d   : > { %2052 = vmatmul.mubr.f32.gmra.mrb[22].mxu1 %v2435_v58 }
 0x664   : > { %v2035_v12 = vpop.f32.mrb[16].mxu1 }
 0x665   : > { %v2036_v10 = vadd.f32 %v2035_v12, %v1962_v9  ;;  %v2037_v13 = vpop.f32.mrb[17].mxu1 }
 0x666   : > { %v2038_v14 = vadd.f32 %v2037_v13, %v1966_v11 }
 0x667   : > { %v2058_v16 = vadd.f32 %v2916_v15, %v2036_v10 }
 0x668   : > { %v2059_v19 = vadd.f32 %v2917_v17, %v2038_v14  ;;  %v2041_v21 = vpop.f32.mrb[18].mxu1 }
 0x669   : > { %v2042_v26 = vadd.f32 %v2041_v21, %v1962_v9  ;;  %v2043_v8 = vpop.f32.mrb[19].mxu1 }
 0x66a   : > { %v2044_v20 = vadd.f32 %v2043_v8, %v1966_v11  ;;  %v2066_v30 = vadd.f32 %v2059_v19, %v2058_v16  ;;  %v2131_v8 = vld [vmem:[%s3955_s22] sm:$0x3]  ;;  %s3156_s22 = scalar_lea.vmem %s3155_s20, 2048 }
 0x66b   : > { %v2060_v32 = vadd.f32 %v2918_v31, %v2042_v26  ;;  %v2151_v31 = vld [vmem:[%s3956_s18] sm:$0x3]  ;;  %p3158_p8 = scmp.lt.s32.totalorder %s3156_s22, %s3150_s1 }
 0x66c   : > { %v2061_v34 = vadd.f32 %v2919_v33, %v2044_v20  ;;  %v2047_v35 = vpop.f32.mrb[20].mxu1  ;;  %2067 = vadd.xlane.f32.xlu1 %v2066_v30  ;;  %v2136_v33 = vrot.slane %v2131_v8, %v3688_v49 }
 0x66d   : > { %v2048_v18 = vadd.f32 %v2047_v35, %v1962_v9  ;;  %v2049_v22 = vpop.f32.mrb[21].mxu1  ;;  %p3159_p6 = por %p3158_p8, %p3157_p13 }
 0x66e   : > { %v2050_v36 = vadd.f32 %v2049_v22, %v1966_v11  ;;  %v2069_v37 = vadd.f32 %v2061_v34, %v2060_v32  ;;  %v2156_v22 = vrot.slane %v2151_v31, %v3688_v49 }
 0x66f   : > { %v2062_v38 = vadd.f32 %v2920_v6, %v2048_v18  ;;  %p3160_p9 = pnand %p3159_p6, %p3153_p12 }
 0x670   : > { %v2063_v25 = vadd.f32 %v2921_v39, %v2050_v36  ;;  %v2053_v40 = vpop.f32.mrb[22].mxu1  ;;  %2070 = vadd.xlane.f32.xlu0 %v2069_v37  ;;  %v2160_v36 = vrot.slane %v2151_v31, %v3699_v53 }
 0x671   : > { %v2054_v24 = vadd.f32 %v2053_v40, %v1962_v9  ;;  %v2055_v23 = vpop.f32.mrb[23].mxu1 }
 0x672   : > { %v2056_v27 = vadd.f32 %v2055_v23, %v1966_v11  ;;  %v2072_v51 = vadd.f32 %v2063_v25, %v2062_v38 }
 0x673   : > { %v2064_v42 = vadd.f32 %v2922_v41, %v2054_v24 }
 0x674   : > { %v2065_v44 = vadd.f32 %v2923_v43, %v2056_v27  ;;  %2073 = vadd.xlane.f32.xlu1 %v2072_v51 }
 0x676   : > { %v2075_v45 = vadd.f32 %v2065_v44, %v2064_v42 }
 0x678   : > { %2076 = vadd.xlane.f32.xlu0 %v2075_v45 }
 0x6f9   : > { %v2068_v46 = vpop.xlane.xlu1 %2067 }
 0x6fa   : > { %v2079_v29 = vmul.f32 0.00390625, %v2068_v46 }
 0x6fc   : > { %v2083_v47 = vsub.f32 %v2058_v16, %v2079_v29  ;;  %v2084_v48 = vsub.f32 %v2059_v19, %v2079_v29 }
 0x6fd   : > { %v2071_v28 = vpop.xlane.xlu0 %2070 }
 0x6fe   : > { %v2080_v1 = vmul.f32 0.00390625, %v2071_v28  ;;  %v2091_v2 = vmul.f32 %v2083_v47, %v2083_v47  ;;  %v2092_v50 = vmul.f32 %v2084_v48, %v2084_v48 }
 0x700   : > { %v2085_v3 = vsub.f32 %v2060_v32, %v2080_v1  ;;  %v2086_v4 = vsub.f32 %v2061_v34, %v2080_v1  ;;  %v2099_v5 = vadd.f32 %v2092_v50, %v2091_v2  ;;  %v2140_v34 = vrot.slane %v2131_v8, %v3699_v53 }
 0x701   : > { %v2074_v7 = vpop.xlane.xlu1 %2073 }
 0x702   : > { %v2081_v52 = vmul.f32 0.00390625, %v2074_v7  ;;  %2100 = vadd.xlane.f32.xlu1 %v2099_v5  ;;  %v2093_v54 = vmul.f32 %v2085_v3, %v2085_v3  ;;  %v2094_v55 = vmul.f32 %v2086_v4, %v2086_v4 }
 0x704   : > { %v2087_v56 = vsub.f32 %v2062_v38, %v2081_v52  ;;  %v2088_v57 = vsub.f32 %v2063_v25, %v2081_v52  ;;  %v2102_v58 = vadd.f32 %v2094_v55, %v2093_v54 }
 0x705   : > { %v2077_v59 = vpop.xlane.xlu0 %2076 }
 0x706   : > { %v2082_v60 = vmul.f32 0.00390625, %v2077_v59  ;;  %2103 = vadd.xlane.f32.xlu0 %v2102_v58  ;;  %v2095_v61 = vmul.f32 %v2087_v56, %v2087_v56  ;;  %v2096_v62 = vmul.f32 %v2088_v57, %v2088_v57 }
 0x708   : > { %v2089_v63 = vsub.f32 %v2064_v42, %v2082_v60  ;;  %v2090_v0 = vsub.f32 %v2065_v44, %v2082_v60  ;;  %v2105_v9 = vadd.f32 %v2096_v62, %v2095_v61 }
 0x70a   : > { %2106 = vadd.xlane.f32.xlu1 %v2105_v9  ;;  %v2097_v11 = vmul.f32 %v2089_v63, %v2089_v63  ;;  %v2098_v12 = vmul.f32 %v2090_v0, %v2090_v0 }
 0x70c   : > { %v2108_v10 = vadd.f32 %v2098_v12, %v2097_v11 }
 0x70e   : > { %2109 = vadd.xlane.f32.xlu0 %v2108_v10 }
 0x78f   : > { %v2101_v13 = vpop.xlane.xlu1 %2100 }
 0x790   : > { %v2111_v14 = vmul.f32 0.00390625, %v2101_v13 }
 0x792   : > { %v2115_v15 = vadd.f32 1e-12, %v2111_v14 }
 0x793   : > { %v2104_v16 = vpop.xlane.xlu0 %2103 }
 0x794   : > { %2908 = vrsqrt.f32 %v2115_v15  ;;  %v2112_v17 = vmul.f32 0.00390625, %v2104_v16 }
 0x796   : > { %v2116_v19 = vadd.f32 1e-12, %v2112_v17 }
 0x797   : > { %v2107_v21 = vpop.xlane.xlu1 %2106 }
 0x798   : > { %2910 = vrsqrt.f32 %v2116_v19  ;;  %v2113_v26 = vmul.f32 0.00390625, %v2107_v21 }
 0x79a   : > { %v2117_v20 = vadd.f32 1e-12, %v2113_v26 }
 0x79b   : > { %v2110_v30 = vpop.xlane.xlu0 %2109 }
 0x79c   : > { %2912 = vrsqrt.f32 %v2117_v20  ;;  %v2114_v32 = vmul.f32 0.00390625, %v2110_v30 }
 0x79e   : > { %v2909_v35 = vpop.eup %2908  ;;  %v2118_v18 = vadd.f32 1e-12, %v2114_v32 }
 0x79f   : > { %v2123_v37 = vmul.f32 %v2909_v35, %v2083_v47  ;;  %v2124_v6 = vmul.f32 %v2909_v35, %v2084_v48 }
 0x7a0   : > { %2914 = vrsqrt.f32 %v2118_v18 }
 0x7a1   : > { %v2143_v38 = vmul.f32 %v2136_v33, %v2123_v37  ;;  %v2144_v39 = vmul.f32 %v2140_v34, %v2124_v6 }
 0x7a2   : > { %v2911_v25 = vpop.eup %2910 }
 0x7a3   : > { %v2163_v40 = vadd.f32 %v2156_v22, %v2143_v38  ;;  %v2164_v24 = vadd.f32 %v2160_v36, %v2144_v39  ;;  %v2125_v23 = vmul.f32 %v2911_v25, %v2085_v3  ;;  %v2126_v27 = vmul.f32 %v2911_v25, %v2086_v4 }
 0x7a5   : > { %2171 = vst [vmem:[%s588_s25] sm:$0xff] %v2163_v40  ;;  %2172 = vst [vmem:[%s588_s25 + $0x8] sm:$0xff] %v2164_v24  ;;  %v2145_v51 = vmul.f32 %v2136_v33, %v2125_v23  ;;  %v2146_v41 = vmul.f32 %v2140_v34, %v2126_v27 }
 0x7a6   : > { %v2913_v49 = vpop.eup %2912 }
 0x7a7   : > { %v2165_v42 = vadd.f32 %v2156_v22, %v2145_v51  ;;  %v2166_v53 = vadd.f32 %v2160_v36, %v2146_v41  ;;  %v2127_v43 = vmul.f32 %v2913_v49, %v2087_v56  ;;  %v2128_v44 = vmul.f32 %v2913_v49, %v2088_v57 }
 0x7a9   : > { %2173 = vst [vmem:[%s588_s25 + $0x10] sm:$0xff] %v2165_v42  ;;  %2174 = vst [vmem:[%s588_s25 + $0x18] sm:$0xff] %v2166_v53  ;;  %v2147_v45 = vmul.f32 %v2136_v33, %v2127_v43  ;;  %v2148_v46 = vmul.f32 %v2140_v34, %v2128_v44 }
 0x7aa   : > { %v2915_v29 = vpop.eup %2914 }
 0x7ab   : > { %v2167_v47 = vadd.f32 %v2156_v22, %v2147_v45  ;;  %v2168_v48 = vadd.f32 %v2160_v36, %v2148_v46  ;;  %v2129_v28 = vmul.f32 %v2915_v29, %v2089_v63  ;;  %v2130_v1 = vmul.f32 %v2915_v29, %v2090_v0 }
 0x7ad   : > { %2175 = vst [vmem:[%s588_s25 + $0x20] sm:$0xff] %v2167_v47  ;;  %2176 = vst [vmem:[%s588_s25 + $0x28] sm:$0xff] %v2168_v48  ;;  %v2149_v2 = vmul.f32 %v2136_v33, %v2129_v28  ;;  %v2150_v50 = vmul.f32 %v2140_v34, %v2130_v1 }
 0x7af   : > { %v2169_v3 = vadd.f32 %v2156_v22, %v2149_v2  ;;  %v2170_v4 = vadd.f32 %v2160_v36, %v2150_v50 }
 0x7b1   : > { %2177 = vst [vmem:[%s588_s25 + $0x30] sm:$0xff] %v2169_v3  ;;  %2178 = vst [vmem:[%s588_s25 + $0x38] sm:$0xff] %v2170_v4 }
 0x7b2   : > { %3163 = shalt.err (!%p3160_p9)
}
 0x7b3   : > { %s3164_s5 = scalar_lea.hbm %s3856_s14, 1024  ;;  %s3168_s25 = scalar_lea.hbm %s3957_s28, 2048 }
 0x7b4   : > { %p3165_p4 = scmp.ne.s32.totalorder %s3856_s14, %s3164_s5  ;;  %p3169_p5 = scmp.lt.u32.totalorder %s3856_s14, %s3957_s28 }
 0x7b5   : > { %p3170_p2 = scmp.lt.u32.totalorder %s3168_s25, %s3164_s5  ;;  %p3172_p10 = scmp.lt.u32.totalorder %s3164_s5, %s3856_s14 }
 0x7b6   : > { %p3166_p3 = pnand %p3165_p4, %p3958_p1 }
 0x7b7   : > { %p3171_p7 = por %p3170_p2, %p3169_p5 }
 0x7b8   : > { %p3167_p0 = pneg %p3166_p3 }
 0x7b9   : > { %p3173_p11 = por %p3172_p10, %p3171_p7 }
 0x7bb   : > { %p3174_p12 = pnand %p3173_p11, %p3167_p0 }
 0x7bd   : > { %3177 = shalt.err (!%p3174_p12)
}
 0x7be   : > { %s3248_s12 = smov 256   ;;  %s3249_s1 = smov 16  }
 0x7bf   : > { %2782 = dma.vmem_to_hbm [thread:$0]  (%p3958_p1), %s3858_s17, 1024, %s3856_s14, %s2180_s19, %s3248_s12, %s3248_s12, %s3249_s1  }
 0x7c0 PF: > { %s2209_s23 = sand.u32 1, %s3220_s29   ;;  %p3959_p13 = scmp.ne.s32.totalorder %s3941_s11, 0 }
 0x7c1   : > { %p3960_p8 = scmp.ge.s32.totalorder %s3232_s16, 2  ;;  %s2210_s20 = scalar_lea.sflag [#allocation4], %s2209_s23 }
 0x7c3   : > { %p2811_p6 = pnand %p3960_p8, %p3959_p13 }
 0x7c5   : > { %3215 = dma.done.wait (!%p2811_p6), %s2210_s20, 1024  }
 0x7c6   : > { %3217 = vsyncadd (!%p2811_p6), %s2210_s20, 4294966272  ;;  %p31_p9 = scmp.ge.s32.totalorder %s3536_s21, 4   ;;  %s3961_s29 = smov %s3224_s30 }
 0x7c7   : > { %s3962_s30 = smov %s3228_s15  ;;  %s3963_s15 = smov %s3548_s26 }
 0x7c8   : > { %s3964_s16 = smov %s3536_s21  ;;  %33 = sbr.rel (!%p31_p9) target bundleno = 18 (0x12), region = 149 }
 0x7cf   :  { %2215 = vsyncpa [#allocation3], 1 }
 0x7d0   :  { %2217 = vsyncpa [#allocation3 + $0x1], 1 }
 0x7d1   :  { %2218 = vsyncpa [#allocation6], 1 }
 0x7d2   :  { %2219 = vsyncpa [#allocation9], 1 }
 0x7d3   :  { %2220 = vsyncpa [#allocation12], 1 }
 0x7d4   :  { %2221 = vsyncpa [#allocation15], 1 }
 0x7d5   :  { %2222 = vsyncpa [#allocation4], 1 }
 0x7d6   :  { %2224 = vsyncpa [#allocation4 + $0x1], 1 }

</bundles_post_ra>
